<compile_context>
chip_gen: v6e
topology: v6e:2x2x1
jax: 0.10.0
libtpu: 0.0.40
codegen_flags: <defaults>
</compile_context>

<pallas_src>
import math
from functools import partial

import jax
import jax.numpy as jnp
from jax.experimental import pallas as pl
from jax.experimental.pallas import tpu as pltpu


_MAT_KEYS = ("wq", "wk", "wv", "wo", "w1", "w2")
_VEC_KEYS = ("a1", "g1", "bq", "bk", "bv", "bo", "a2", "g2", "b2")  # packed (L,9,E)


# ----------------------------------------------------------------------------
# Small helpers
# ----------------------------------------------------------------------------
def _vmem_budget_bytes():
    """Generation-aware VMEM budget: ~48 MiB on 128-MiB parts (v5e/v6e),
    ~24 MiB on 64-MiB parts (v7x)."""
    cap = 128 * 1024 * 1024
    try:
        cap = int(pltpu.get_tpu_info().vmem_capacity_bytes)
    except Exception:
        pass
    return max(16 * 1024 * 1024, min((cap * 3) // 8, 48 * 1024 * 1024))


def _num_batch_blocks(batch):
    # Small leading "parallel" axis (2) so both v7x TensorCores get work, while
    # layer weights are streamed at most twice per forward (not once per batch).
    return 2 if (batch % 2 == 0 and batch >= 2) else 1


def _layernorm(x, alpha, bias, eps):
    # torch Norm: alpha * (x - mean) / (std + eps) + bias, unbiased std (ddof=1)
    mean = jnp.mean(x, axis=-1, keepdims=True)
    d = x - mean
    var = jnp.sum(d * d, axis=-1, keepdims=True) * (1.0 / (x.shape[-1] - 1))
    inv = pl.reciprocal(jnp.sqrt(var) + eps, approx=True)   # EUP, not a VPU divide
    return alpha * d * inv + bias


# ----------------------------------------------------------------------------
# Kernels
# ----------------------------------------------------------------------------
def embed_kernel(src_ref, pe_ref, w_ref, b_ref, out_ref, *, scale, bb):
    """(src @ W_in + b_in) * sqrt(E) + positional encoding.

    grid = (nb, vocab_chunks); the output block (bb, S, E) is revisited across
    the vocab axis and used directly as the f32 accumulator.
    """
    c = pl.program_id(1)

    @pl.when(c == 0)
    def _init():
        out_ref[...] = jnp.zeros_like(out_ref)

    for bi in range(bb):
        out_ref[bi] += jnp.dot(src_ref[bi], w_ref[...],
                               preferred_element_type=jnp.float32)

    @pl.when(c == pl.num_programs(1) - 1)
    def _finalize():
        out_ref[...] = (out_ref[...] + b_ref[...]) * scale + pe_ref[...]


def encoder_layers_kernel(x_ref, maskb_ref, vec_ref,
                          wq_ref, wk_ref, wv_ref, wo_ref,
                          w1_ref, b1_ref, w2_ref,
                          out_ref, *rest, heads, eps, bb, has_attn):
    """grid = (nb, L, KC).

    The residual stream lives in `out_ref` (block index depends only on the
    outer parallel batch axis, so it is VMEM-resident across layers and d_ff
    chunks).  Attention + both layer norms run once per layer (kc == 0); the
    feed-forward is streamed over d_ff chunks with an f32 VMEM accumulator.
    """
    if has_attn:
        attn_ref, x2ff_ref, ffacc_ref = rest
    else:
        attn_ref = None
        x2ff_ref, ffacc_ref = rest

    layer = pl.program_id(1)
    kc = pl.program_id(2)
    n_kc = pl.num_programs(2)
    bf16 = jnp.bfloat16

    @pl.when((layer == 0) & (kc == 0))
    def _seed():
        out_ref[...] = x_ref[...]            # seed the VMEM-resident residual

    @pl.when(kc == 0)
    def _attention():
        vecs = vec_ref[0]                    # (9, E) f32, packed per-layer vectors
        a1, g1 = vecs[0:1], vecs[1:2]
        bq, bk = vecs[2:3], vecs[3:4]
        bv, bo = vecs[4:5], vecs[5:6]
        a2, g2 = vecs[6:7], vecs[7:8]
        wq, wk, wv, wo = wq_ref[0], wk_ref[0], wv_ref[0], wo_ref[0]
        E = wq.shape[0]
        d_k = E // heads
        inv_sqrt_dk = 1.0 / math.sqrt(d_k)

        for bi in range(bb):
            x = out_ref[bi]                                  # (S, E) f32
            x2 = _layernorm(x, a1, g1, eps).astype(bf16)
            q = jnp.dot(x2, wq, preferred_element_type=jnp.float32) + bq
            k = jnp.dot(x2, wk, preferred_element_type=jnp.float32) + bk
            v = jnp.dot(x2, wv, preferred_element_type=jnp.float32) + bv

            # TODO(synk): replace the per-head stack/concat with reshape-based
            # einsums (and 2-head MXU packing) once E and d_k are 128-aligned;
            # explicit lane slices are the guaranteed-lowering path at tiny d_k.
            def split_heads(t):
                return jnp.stack(
                    [t[:, h * d_k:(h + 1) * d_k] for h in range(heads)],
                    axis=0).astype(bf16)

            q3, k3, v3 = split_heads(q), split_heads(k), split_heads(v)

            scores = jnp.einsum("hqd,hkd->hqk", q3, k3,
                                preferred_element_type=jnp.float32) * inv_sqrt_dk
            scores = scores + maskb_ref[bi]                  # additive 0 / -1e9

            m = jnp.max(scores, axis=-1, keepdims=True)
            p = jnp.exp(scores - m)
            sm = p * pl.reciprocal(jnp.sum(p, axis=-1, keepdims=True), approx=True)

            if attn_ref is not None:
                attn_ref[bi] = sm.astype(attn_ref.dtype)     # bf16 store

            o3 = jnp.einsum("hqk,hkd->hqd", sm.astype(bf16), v3,
                            preferred_element_type=jnp.float32)
            concat = jnp.concatenate([o3[h] for h in range(heads)], axis=-1)
            attn_out = jnp.dot(concat.astype(bf16), wo,
                               preferred_element_type=jnp.float32) + bo

            x = x + attn_out
            out_ref[bi] = x
            x2ff_ref[bi] = _layernorm(x, a2, g2, eps).astype(bf16)  # FFN input

        ffacc_ref[...] = jnp.zeros_like(ffacc_ref)

    # ---- feed-forward, streamed in d_ff chunks (runs every kc step) ----
    w1c = w1_ref[0]                                          # (E, tf)  bf16
    b1c = b1_ref[0]                                          # (1, tf)  f32
    w2c = w2_ref[0]                                          # (tf, E)  bf16
    for bi in range(bb):
        h1 = jnp.maximum(
            jnp.dot(x2ff_ref[bi], w1c, preferred_element_type=jnp.float32) + b1c,
            0.0)
        ffacc_ref[bi] += jnp.dot(h1.astype(bf16), w2c,
                                 preferred_element_type=jnp.float32)

    @pl.when(kc == n_kc - 1)
    def _finalize():
        b2 = vec_ref[0, 8:9]                                 # (1, E)
        out_ref[...] = out_ref[...] + ffacc_ref[...] + b2


# ----------------------------------------------------------------------------
# Wrappers (glue in plain JAX)
# ----------------------------------------------------------------------------
def positional_encoding(seq_len, emb):
    # replicate the PyTorch PositionalEncoder table exactly
    pos = jnp.arange(seq_len, dtype=jnp.float32)[:, None]
    i_even = jnp.arange(0, emb, 2, dtype=jnp.float32)
    sin_part = jnp.sin(pos / 10000.0 ** (2.0 * i_even / emb))
    cos_part = jnp.cos(pos / 10000.0 ** (2.0 * (i_even + 1.0) / emb))
    pe = jnp.stack([sin_part, cos_part], axis=-1).reshape(seq_len, emb)
    return pe.astype(jnp.float32)


def embed_forward(src, w_in, b_in, pe):
    B, S, V = src.shape
    E = w_in.shape[1]
    nb = _num_batch_blocks(B)
    bb = B // nb
    tv = 512 if (V > 512 and V % 512 == 0) else V   # lane-aligned vocab chunk
    n_vc = V // tv
    return pl.pallas_call(
        partial(embed_kernel, scale=math.sqrt(E), bb=bb),
        out_shape=jax.ShapeDtypeStruct((B, S, E), jnp.float32),
        grid=(nb, n_vc),
        in_specs=[
            pl.BlockSpec((bb, S, tv), lambda b, c: (b, 0, c)),   # src chunk (bf16)
            pl.BlockSpec((S, E), lambda b, c: (0, 0)),           # pe
            pl.BlockSpec((tv, E), lambda b, c: (c, 0)),          # w_in chunk (bf16)
            pl.BlockSpec((1, E), lambda b, c: (0, 0)),           # b_in
        ],
        out_specs=pl.BlockSpec((bb, S, E), lambda b, c: (b, 0, 0)),
        compiler_params=pltpu.CompilerParams(
            dimension_semantics=("parallel", "arbitrary"),
            vmem_limit_bytes=_vmem_budget_bytes()),
    )(src.astype(jnp.bfloat16), pe, w_in.astype(jnp.bfloat16), b_in)


def stack_layer_params(layers):
    """Stack per-layer params along a leading layer axis.

    Matrices -> bf16; the 9 small per-layer vectors are packed into one
    (L, 9, E) tensor so each layer needs a single tiny DMA instead of 10.
    """
    stack = lambda name: jnp.stack([lyr[name] for lyr in layers])
    mats = {k: stack(k).astype(jnp.bfloat16) for k in _MAT_KEYS}
    vecs = jnp.stack([jnp.concatenate([lyr[k] for k in _VEC_KEYS], axis=0)
                      for lyr in layers]).astype(jnp.float32)        # (L, 9, E)
    b1 = stack("b1").astype(jnp.float32)                             # (L, 1, d_ff)
    return mats, vecs, b1


def encoder_layers_forward(x, mask, mats, vecs, b1, heads, eps=1e-6,
                           return_attn=False):
    B, S, E = x.shape
    L = vecs.shape[0]
    d_ff = b1.shape[-1]
    H = heads
    nb = _num_batch_blocks(B)
    bb = B // nb

    # d_ff streamed in lane-aligned chunks so only (E,tf)+(tf,E) weight slabs
    # and an (S,tf) h1 slab live in VMEM per step (fits v7x's 64 MiB).
    if d_ff > 512 and d_ff % 512 == 0:
        tf = 512
    elif d_ff > 256 and d_ff % 256 == 0:
        tf = 256
    elif d_ff > 128 and d_ff % 128 == 0:
        tf = 128
    else:
        tf = d_ff
    n_kc = d_ff // tf

    # Additive mask bias (0 keep / -1e9 masked), computed once in the wrapper.
    mask_bias = jnp.where(mask == 0, -1e9, 0.0).astype(jnp.float32)   # (B,1,S)

    in_specs = [
        pl.BlockSpec((bb, S, E), lambda b, l, c: (b, 0, 0)),    # residual seed
        pl.BlockSpec((bb, 1, S), lambda b, l, c: (b, 0, 0)),    # mask bias
        pl.BlockSpec((1, 9, E), lambda b, l, c: (l, 0, 0)),     # packed vectors
        pl.BlockSpec((1, E, E), lambda b, l, c: (l, 0, 0)),     # wq
        pl.BlockSpec((1, E, E), lambda b, l, c: (l, 0, 0)),     # wk
        pl.BlockSpec((1, E, E), lambda b, l, c: (l, 0, 0)),     # wv
        pl.BlockSpec((1, E, E), lambda b, l, c: (l, 0, 0)),     # wo
        pl.BlockSpec((1, E, tf), lambda b, l, c: (l, 0, c)),    # w1 chunk
        pl.BlockSpec((1, 1, tf), lambda b, l, c: (l, 0, c)),    # b1 chunk
        pl.BlockSpec((1, tf, E), lambda b, l, c: (l, c, 0)),    # w2 chunk
    ]

    out_shape = [jax.ShapeDtypeStruct((B, S, E), jnp.float32)]
    out_specs = [pl.BlockSpec((bb, S, E), lambda b, l, c: (b, 0, 0))]
    if return_attn:
        # bf16 attention probabilities, one (bb,H,S,S) block per (layer, b-block)
        out_shape.append(jax.ShapeDtypeStruct((L * B, H, S, S), jnp.bfloat16))
        out_specs.append(
            pl.BlockSpec((bb, H, S, S), lambda b, l, c: (l * nb + b, 0, 0, 0)))

    res = pl.pallas_call(
        partial(encoder_layers_kernel, heads=heads, eps=eps, bb=bb,
                has_attn=return_attn),
        out_shape=tuple(out_shape),
        grid=(nb, L, n_kc),                       # layer / d_ff axes innermost
        in_specs=in_specs,
        out_specs=tuple(out_specs),
        scratch_shapes=[pltpu.VMEM((bb, S, E), jnp.bfloat16),   # norm2(x) for FFN
                        pltpu.VMEM((bb, S, E), jnp.float32)],   # FFN accumulator
        input_output_aliases={0: 0},              # residual stream in-place
        compiler_params=pltpu.CompilerParams(
            dimension_semantics=("parallel", "arbitrary", "arbitrary"),
            vmem_limit_bytes=_vmem_budget_bytes()),
        # TODO(synk): on v5e, raise pipeline depth on the streamed w1/w2 specs
        #             (pipeline_mode=pl.Buffered(3)) to hide weight DMA at small S.
    )(x, mask_bias, vecs,
      mats["wq"], mats["wk"], mats["wv"], mats["wo"],
      mats["w1"], b1, mats["w2"])

    if return_attn:
        x_out, attn_flat = res
        attn = attn_flat.reshape(L, B, H, S, S)
        return x_out, [attn[i] for i in range(L)]
    (x_out,) = res
    return x_out, None


def encoder_forward(src, mask, params, heads, return_attn=False):
    B, S, V = src.shape
    E = params["w_in"].shape[1]
    pe = positional_encoding(S, E)
    if V != E:
        x = embed_forward(src, params["w_in"], params["b_in"], pe)
    else:
        # Encoder skips the input linear when vocab == emb (trivially mem-bound).
        x = src * math.sqrt(E) + pe[None]
    mats, vecs, b1 = stack_layer_params(params["layers"])
    return encoder_layers_forward(x, mask, mats, vecs, b1, heads,
                                  return_attn=return_attn)


# ----------------------------------------------------------------------------
# Deterministic parameter init (weights stored pre-transposed: x @ W)
# ----------------------------------------------------------------------------
def init_params(key, vocab, emb, n_layers, d_ff):
    def nrm(k, shape, s=0.05):
        return jax.random.normal(k, shape, jnp.float32) * s

    keys = jax.random.split(key, 2 + n_layers)
    params = {
        "w_in": nrm(keys[0], (vocab, emb)),
        "b_in": nrm(keys[1], (1, emb)),
        "layers": [],
    }
    for i in range(n_layers):
        lk = jax.random.split(keys[2 + i], 12)
        params["layers"].append(dict(
            a1=jnp.ones((1, emb), jnp.float32), g1=jnp.zeros((1, emb), jnp.float32),
            wq=nrm(lk[0], (emb, emb)), bq=nrm(lk[1], (1, emb)),
            wk=nrm(lk[2], (emb, emb)), bk=nrm(lk[3], (1, emb)),
            wv=nrm(lk[4], (emb, emb)), bv=nrm(lk[5], (1, emb)),
            wo=nrm(lk[6], (emb, emb)), bo=nrm(lk[7], (1, emb)),
            a2=jnp.ones((1, emb), jnp.float32), g2=jnp.zeros((1, emb), jnp.float32),
            w1=nrm(lk[8], (emb, d_ff)), b1=nrm(lk[9], (1, d_ff)),
            w2=nrm(lk[10], (d_ff, emb)), b2=nrm(lk[11], (1, emb)),
        ))
    return params


def round_matrices_to_bf16(params):
    """Round weight matrices to bf16 (and back to f32) so the Pallas kernel
    (bf16 weights in HBM) and the f32 reference use identical weight values."""
    r = lambda a: a.astype(jnp.bfloat16).astype(jnp.float32)
    out = {"w_in": r(params["w_in"]), "b_in": params["b_in"], "layers": []}
    for L in params["layers"]:
        out["layers"].append(
            {k: (r(v) if k in _MAT_KEYS else v) for k, v in L.items()})
    return out


# ----------------------------------------------------------------------------
# Pure-JAX reference (mirrors PyTorch semantics) for a correctness check
# ----------------------------------------------------------------------------
def _ln_ref(x, a, b, eps=1e-6):
    m = x.mean(-1, keepdims=True)
    d = x - m
    std = jnp.sqrt((d * d).sum(-1, keepdims=True) / (x.shape[-1] - 1))
    return a * d / (std + eps) + b


def ref_forward(src, mask, params, heads):
    B, S, V = src.shape
    E = params["w_in"].shape[1]
    x = src @ params["w_in"] + params["b_in"]
    x = x * math.sqrt(E) + positional_encoding(S, E)[None]
    d_k = E // heads
    attns = []
    for L in params["layers"]:
        x2 = _ln_ref(x, L["a1"], L["g1"])
        q = (x2 @ L["wq"] + L["bq"]).reshape(B, S, heads, d_k).transpose(0, 2, 1, 3)
        k = (x2 @ L["wk"] + L["bk"]).reshape(B, S, heads, d_k).transpose(0, 2, 1, 3)
        v = (x2 @ L["wv"] + L["bv"]).reshape(B, S, heads, d_k).transpose(0, 2, 1, 3)
        scores = q @ k.transpose(0, 1, 3, 2) / math.sqrt(d_k)
        scores = jnp.where(mask[:, None] == 0, -1e9, scores)
        sm = jax.nn.softmax(scores, axis=-1)
        o = (sm @ v).transpose(0, 2, 1, 3).reshape(B, S, E)
        x = x + o @ L["wo"] + L["bo"]
        x2 = _ln_ref(x, L["a2"], L["g2"])
        x = x + jnp.maximum(x2 @ L["w1"] + L["b1"], 0.0) @ L["w2"] + L["b2"]
        attns.append(sm)
    return x, attns


# ----------------------------------------------------------------------------
if __name__ == "__main__":
    B, S, VOCAB, EMB, N_LAYERS, HEADS = 2, 8, 16, 32, 2, 4
    D_FF = 2048  # FeedForward default in the PyTorch module

    key = jax.random.PRNGKey(0)
    k_par, k_src = jax.random.split(key)
    params = init_params(k_par, VOCAB, EMB, N_LAYERS, D_FF)
    # kernel stores weight matrices in bf16; round them here so the f32
    # reference sees numerically identical weights
    params = round_matrices_to_bf16(params)

    src = jax.random.normal(k_src, (B, S, VOCAB), jnp.float32)
    # mask: 1 = keep, 0 = masked; mask out the last key position of batch 1
    mask = jnp.ones((B, 1, S), jnp.float32).at[1, 0, S - 1].set(0.0)

    fwd = jax.jit(partial(encoder_forward, heads=HEADS, return_attn=True))
    x_out, attns = fwd(src, mask, params)
    jax.block_until_ready(x_out)
    jax.block_until_ready(attns)

    # sanity-check against the pure-JAX f32 reference (bf16 matmul inputs,
    # bf16 attn store and approx reciprocals => slightly loose tolerance)
    x_ref, attns_ref = ref_forward(src, mask, params, HEADS)
    assert jnp.allclose(x_out, x_ref, rtol=2e-2, atol=5e-2), "output mismatch"
    for a, ar in zip(attns, attns_ref):
        assert jnp.allclose(a.astype(jnp.float32), ar, rtol=2e-2, atol=2e-2), \
            "attention mismatch"

    print("KERNEL_OK")
</pallas_src>

<mosaic_0001>
module attributes {stable_mosaic.version = 11 : i64} {
  func.func @embed_kernel(%arg0: i32, %arg1: i32, %arg2: memref<1x8x16xbf16, #tpu.memory_space<vmem>>, %arg3: memref<8x32xf32, #tpu.memory_space<vmem>>, %arg4: memref<16x32xbf16, #tpu.memory_space<vmem>>, %arg5: memref<1x32xf32, #tpu.memory_space<vmem>>, %arg6: memref<1x8x32xf32, #tpu.memory_space<vmem>>) attributes {dimension_semantics = [#tpu.dimension_semantics<parallel>, #tpu.dimension_semantics<arbitrary>], iteration_bounds = array<i64: 2, 1>, scalar_prefetch = 0 : i64, scratch_operands = 0 : i64, tpu.core_type = #tpu.core_type<tc>, window_params = [{transform_indices = @transform_0, window_bounds = array<i64: 1, 8, 16>}, {pipeline_mode = #tpu.pipeline_mode<synchronous>, transform_indices = @transform_1, window_bounds = array<i64: 8, 32>}, {transform_indices = @transform_2, window_bounds = array<i64: 16, 32>}, {pipeline_mode = #tpu.pipeline_mode<synchronous>, transform_indices = @transform_3, window_bounds = array<i64: 1, 32>}, {transform_indices = @transform_4, window_bounds = array<i64: 1, 8, 32>}]} {
    %c0_i32 = arith.constant 0 : i32
    %0 = arith.cmpi eq, %arg1, %c0_i32 : i32
    %1 = arith.extui %0 : i1 to i32
    %c0_i32_0 = arith.constant 0 : i32
    %2 = arith.cmpi ne, %1, %c0_i32_0 : i32
    scf.if %2 {
      %cst_13 = arith.constant 0.000000e+00 : f32
      %16 = vector.broadcast %cst_13 : f32 to vector<1x8x32xf32>
      %c0_14 = arith.constant 0 : index
      %c0_15 = arith.constant 0 : index
      %c0_16 = arith.constant 0 : index
      %17 = vector.load %arg6[%c0_14, %c0_15, %c0_16] : memref<1x8x32xf32, #tpu.memory_space<vmem>>, vector<1x8x32xf32>
      tpu.vector_store %arg6[%c0_14, %c0_15, %c0_16], %16 {strides = array<i32>} : memref<1x8x32xf32, #tpu.memory_space<vmem>>, vector<1x8x32xf32>,
    } else {
    }
    %c0 = arith.constant 0 : index
    %c0_1 = arith.constant 0 : index
    %c0_2 = arith.constant 0 : index
    %3 = vector.load %arg6[%c0, %c0_1, %c0_2] : memref<1x8x32xf32, #tpu.memory_space<vmem>>, vector<1x8x32xf32>
    %4 = vector.shape_cast %3 : vector<1x8x32xf32> to vector<8x32xf32>
    %c0_3 = arith.constant 0 : index
    %c0_4 = arith.constant 0 : index
    %c0_5 = arith.constant 0 : index
    %5 = vector.load %arg2[%c0_3, %c0_4, %c0_5] : memref<1x8x16xbf16, #tpu.memory_space<vmem>>, vector<1x8x16xbf16>
    %6 = vector.shape_cast %5 : vector<1x8x16xbf16> to vector<8x16xbf16>
    %c0_6 = arith.constant 0 : index
    %c0_7 = arith.constant 0 : index
    %7 = vector.load %arg4[%c0_6, %c0_7] : memref<16x32xbf16, #tpu.memory_space<vmem>>, vector<16x32xbf16>
    %cst = arith.constant dense<0.000000e+00> : vector<8x32xf32>
    %8 = tpu.matmul %6, %7, %cst {dimension_numbers = #tpu.dot_dimension_numbers<[1], [0], [0], [1], [0, 0, 1, 1], [], []>} : vector<8x16xbf16>, vector<16x32xbf16>, vector<8x32xf32> -> vector<8x32xf32>
    %9 = arith.addf %4, %8 : vector<8x32xf32>
    %c0_8 = arith.constant 0 : index
    %c0_9 = arith.constant 0 : index
    %c0_10 = arith.constant 0 : index
    %10 = vector.load %arg6[%c0_8, %c0_9, %c0_10] : memref<1x8x32xf32, #tpu.memory_space<vmem>>, vector<1x8x32xf32>
    %11 = vector.shape_cast %10 : vector<1x8x32xf32> to vector<8x32xf32>
    %12 = vector.shape_cast %9 : vector<8x32xf32> to vector<1x8x32xf32>
    tpu.vector_store %arg6[%c0_8, %c0_9, %c0_10], %12 {strides = array<i32>} : memref<1x8x32xf32, #tpu.memory_space<vmem>>, vector<1x8x32xf32>,
    %c0_i32_11 = arith.constant 0 : i32
    %13 = arith.cmpi eq, %arg1, %c0_i32_11 : i32
    %14 = arith.extui %13 : i1 to i32
    %c0_i32_12 = arith.constant 0 : i32
    %15 = arith.cmpi ne, %14, %c0_i32_12 : i32
    scf.if %15 {
      %c0_13 = arith.constant 0 : index
      %c0_14 = arith.constant 0 : index
      %c0_15 = arith.constant 0 : index
      %16 = vector.load %arg6[%c0_13, %c0_14, %c0_15] : memref<1x8x32xf32, #tpu.memory_space<vmem>>, vector<1x8x32xf32>
      %c0_16 = arith.constant 0 : index
      %c0_17 = arith.constant 0 : index
      %17 = vector.load %arg5[%c0_16, %c0_17] : memref<1x32xf32, #tpu.memory_space<vmem>>, vector<1x32xf32>
      %18 = vector.shape_cast %17 : vector<1x32xf32> to vector<1x1x32xf32>
      %19 = vector.broadcast %18 : vector<1x1x32xf32> to vector<1x8x32xf32>
      %20 = arith.addf %16, %19 : vector<1x8x32xf32>
      %cst_18 = arith.constant 5.65685415 : f32
      %21 = vector.broadcast %cst_18 : f32 to vector<1x8x32xf32>
      %22 = arith.mulf %20, %21 : vector<1x8x32xf32>
      %c0_19 = arith.constant 0 : index
      %c0_20 = arith.constant 0 : index
      %23 = vector.load %arg3[%c0_19, %c0_20] : memref<8x32xf32, #tpu.memory_space<vmem>>, vector<8x32xf32>
      %24 = vector.shape_cast %23 : vector<8x32xf32> to vector<1x8x32xf32>
      %25 = arith.addf %22, %24 : vector<1x8x32xf32>
      %c0_21 = arith.constant 0 : index
      %c0_22 = arith.constant 0 : index
      %c0_23 = arith.constant 0 : index
      %26 = vector.load %arg6[%c0_21, %c0_22, %c0_23] : memref<1x8x32xf32, #tpu.memory_space<vmem>>, vector<1x8x32xf32>
      tpu.vector_store %arg6[%c0_21, %c0_22, %c0_23], %25 {strides = array<i32>} : memref<1x8x32xf32, #tpu.memory_space<vmem>>, vector<1x8x32xf32>,
    } else {
    }
    return
  }
  func.func @transform_0(%arg0: i32, %arg1: i32) -> (i32, i32, i32) {
    %c0_i32 = arith.constant 0 : i32
    %c0_i32_0 = arith.constant 0 : i32
    return %arg0, %c0_i32, %arg1 : i32, i32, i32
  }
  func.func @transform_1(%arg0: i32, %arg1: i32) -> (i32, i32) {
    %c0_i32 = arith.constant 0 : i32
    %c0_i32_0 = arith.constant 0 : i32
    %c0_i32_1 = arith.constant 0 : i32
    return %c0_i32, %c0_i32_0 : i32, i32
  }
  func.func @transform_2(%arg0: i32, %arg1: i32) -> (i32, i32) {
    %c0_i32 = arith.constant 0 : i32
    %c0_i32_0 = arith.constant 0 : i32
    return %arg1, %c0_i32 : i32, i32
  }
  func.func @transform_3(%arg0: i32, %arg1: i32) -> (i32, i32) {
    %c0_i32 = arith.constant 0 : i32
    %c0_i32_0 = arith.constant 0 : i32
    %c0_i32_1 = arith.constant 0 : i32
    return %c0_i32, %c0_i32_0 : i32, i32
  }
  func.func @transform_4(%arg0: i32, %arg1: i32) -> (i32, i32, i32) {
    %c0_i32 = arith.constant 0 : i32
    %c0_i32_0 = arith.constant 0 : i32
    %c0_i32_1 = arith.constant 0 : i32
    return %arg0, %c0_i32, %c0_i32_0 : i32, i32, i32
  }
}

module attributes {stable_mosaic.version = 11 : i64} {
  func.func @encoder_layers_kernel(%arg0: i32, %arg1: i32, %arg2: i32, %arg3: memref<1x8x32xf32, #tpu.memory_space<vmem>>, %arg4: memref<1x1x8xf32, #tpu.memory_space<vmem>>, %arg5: memref<1x9x32xf32, #tpu.memory_space<vmem>>, %arg6: memref<1x32x32xbf16, #tpu.memory_space<vmem>>, %arg7: memref<1x32x32xbf16, #tpu.memory_space<vmem>>, %arg8: memref<1x32x32xbf16, #tpu.memory_space<vmem>>, %arg9: memref<1x32x32xbf16, #tpu.memory_space<vmem>>, %arg10: memref<1x32x512xbf16, #tpu.memory_space<vmem>>, %arg11: memref<1x1x512xf32, #tpu.memory_space<vmem>>, %arg12: memref<1x512x32xbf16, #tpu.memory_space<vmem>>, %arg13: memref<1x8x32xf32, #tpu.memory_space<vmem>>, %arg14: memref<1x4x8x8xbf16, #tpu.memory_space<vmem>>, %arg15: memref<1x8x32xbf16, #tpu.memory_space<vmem>>, %arg16: memref<1x8x32xf32, #tpu.memory_space<vmem>>) attributes {dimension_semantics = [#tpu.dimension_semantics<parallel>, #tpu.dimension_semantics<arbitrary>, #tpu.dimension_semantics<arbitrary>], iteration_bounds = array<i64: 2, 2, 4>, scalar_prefetch = 0 : i64, scratch_operands = 2 : i64, tpu.core_type = #tpu.core_type<tc>, window_params = [{transform_indices = @transform_0, window_bounds = array<i64: 1, 8, 32>}, {transform_indices = @transform_1, window_bounds = array<i64: 1, 1, 8>}, {transform_indices = @transform_2, window_bounds = array<i64: 1, 9, 32>}, {transform_indices = @transform_3, window_bounds = array<i64: 1, 32, 32>}, {transform_indices = @transform_4, window_bounds = array<i64: 1, 32, 32>}, {transform_indices = @transform_5, window_bounds = array<i64: 1, 32, 32>}, {transform_indices = @transform_6, window_bounds = array<i64: 1, 32, 32>}, {transform_indices = @transform_7, window_bounds = array<i64: 1, 32, 512>}, {transform_indices = @transform_8, window_bounds = array<i64: 1, 1, 512>}, {transform_indices = @transform_9, window_bounds = array<i64: 1, 512, 32>}, {transform_indices = @transform_10, window_bounds = array<i64: 1, 8, 32>}, {transform_indices = @transform_11, window_bounds = array<i64: 1, 4, 8, 8>}]} {
    %c0_i32 = arith.constant 0 : i32
    %0 = arith.cmpi eq, %arg1, %c0_i32 : i32
    %c0_i32_0 = arith.constant 0 : i32
    %1 = arith.cmpi eq, %arg2, %c0_i32_0 : i32
    %2 = arith.andi %0, %1 : i1
    %3 = arith.extui %2 : i1 to i32
    %c0_i32_1 = arith.constant 0 : i32
    %4 = arith.cmpi ne, %3, %c0_i32_1 : i32
    scf.if %4 {
      %c0_24 = arith.constant 0 : index
      %c0_25 = arith.constant 0 : index
      %c0_26 = arith.constant 0 : index
      %32 = vector.load %arg3[%c0_24, %c0_25, %c0_26] : memref<1x8x32xf32, #tpu.memory_space<vmem>>, vector<1x8x32xf32>
      %c0_27 = arith.constant 0 : index
      %c0_28 = arith.constant 0 : index
      %c0_29 = arith.constant 0 : index
      %33 = vector.load %arg13[%c0_27, %c0_28, %c0_29] : memref<1x8x32xf32, #tpu.memory_space<vmem>>, vector<1x8x32xf32>
      tpu.vector_store %arg13[%c0_27, %c0_28, %c0_29], %32 {strides = array<i32>} : memref<1x8x32xf32, #tpu.memory_space<vmem>>, vector<1x8x32xf32>,
    } else {
    }
    %c0_i32_2 = arith.constant 0 : i32
    %5 = arith.cmpi eq, %arg2, %c0_i32_2 : i32
    %6 = arith.extui %5 : i1 to i32
    %c0_i32_3 = arith.constant 0 : i32
    %7 = arith.cmpi ne, %6, %c0_i32_3 : i32
    scf.if %7 {
      %c0_24 = arith.constant 0 : index
      %c0_25 = arith.constant 0 : index
      %c0_26 = arith.constant 0 : index
      %32 = vector.load %arg5[%c0_24, %c0_25, %c0_26] : memref<1x9x32xf32, #tpu.memory_space<vmem>>, vector<1x9x32xf32>
      %33 = vector.shape_cast %32 : vector<1x9x32xf32> to vector<9x32xf32>
      %34 = vector.extract_strided_slice %33 {offsets = [0, 0], sizes = [1, 32], strides = [1, 1]} : vector<9x32xf32> to vector<1x32xf32>
      %35 = vector.extract_strided_slice %33 {offsets = [1, 0], sizes = [1, 32], strides = [1, 1]} : vector<9x32xf32> to vector<1x32xf32>
      %36 = vector.extract_strided_slice %33 {offsets = [2, 0], sizes = [1, 32], strides = [1, 1]} : vector<9x32xf32> to vector<1x32xf32>
      %37 = vector.extract_strided_slice %33 {offsets = [3, 0], sizes = [1, 32], strides = [1, 1]} : vector<9x32xf32> to vector<1x32xf32>
      %38 = vector.extract_strided_slice %33 {offsets = [4, 0], sizes = [1, 32], strides = [1, 1]} : vector<9x32xf32> to vector<1x32xf32>
      %39 = vector.extract_strided_slice %33 {offsets = [5, 0], sizes = [1, 32], strides = [1, 1]} : vector<9x32xf32> to vector<1x32xf32>
      %40 = vector.extract_strided_slice %33 {offsets = [6, 0], sizes = [1, 32], strides = [1, 1]} : vector<9x32xf32> to vector<1x32xf32>
      %41 = vector.extract_strided_slice %33 {offsets = [7, 0], sizes = [1, 32], strides = [1, 1]} : vector<9x32xf32> to vector<1x32xf32>
      %c0_27 = arith.constant 0 : index
      %c0_28 = arith.constant 0 : index
      %c0_29 = arith.constant 0 : index
      %42 = vector.load %arg6[%c0_27, %c0_28, %c0_29] : memref<1x32x32xbf16, #tpu.memory_space<vmem>>, vector<1x32x32xbf16>
      %43 = vector.shape_cast %42 : vector<1x32x32xbf16> to vector<32x32xbf16>
      %c0_30 = arith.constant 0 : index
      %c0_31 = arith.constant 0 : index
      %c0_32 = arith.constant 0 : index
      %44 = vector.load %arg7[%c0_30, %c0_31, %c0_32] : memref<1x32x32xbf16, #tpu.memory_space<vmem>>, vector<1x32x32xbf16>
      %45 = vector.shape_cast %44 : vector<1x32x32xbf16> to vector<32x32xbf16>
      %c0_33 = arith.constant 0 : index
      %c0_34 = arith.constant 0 : index
      %c0_35 = arith.constant 0 : index
      %46 = vector.load %arg8[%c0_33, %c0_34, %c0_35] : memref<1x32x32xbf16, #tpu.memory_space<vmem>>, vector<1x32x32xbf16>
      %47 = vector.shape_cast %46 : vector<1x32x32xbf16> to vector<32x32xbf16>
      %c0_36 = arith.constant 0 : index
      %c0_37 = arith.constant 0 : index
      %c0_38 = arith.constant 0 : index
      %48 = vector.load %arg9[%c0_36, %c0_37, %c0_38] : memref<1x32x32xbf16, #tpu.memory_space<vmem>>, vector<1x32x32xbf16>
      %49 = vector.shape_cast %48 : vector<1x32x32xbf16> to vector<32x32xbf16>
      %c0_39 = arith.constant 0 : index
      %c0_40 = arith.constant 0 : index
      %c0_41 = arith.constant 0 : index
      %50 = vector.load %arg13[%c0_39, %c0_40, %c0_41] : memref<1x8x32xf32, #tpu.memory_space<vmem>>, vector<1x8x32xf32>
      %51 = vector.shape_cast %50 : vector<1x8x32xf32> to vector<8x32xf32>
      %cst_42 = arith.constant dense<0.000000e+00> : vector<8xf32>
      %52 = vector.multi_reduction <add>, %51, %cst_42 [1] : vector<8x32xf32> to vector<8xf32>
      %53 = vector.shape_cast %52 : vector<8xf32> to vector<8x1xf32>
      %cst_43 = arith.constant 3.200000e+01 : f32
      %54 = vector.broadcast %cst_43 : f32 to vector<8x1xf32>
      %55 = arith.divf %53, %54 : vector<8x1xf32>
      %56 = vector.broadcast %55 : vector<8x1xf32> to vector<8x32xf32>
      %57 = arith.subf %51, %56 : vector<8x32xf32>
      %58 = arith.mulf %57, %57 : vector<8x32xf32>
      %cst_44 = arith.constant dense<0.000000e+00> : vector<8xf32>
      %59 = vector.multi_reduction <add>, %58, %cst_44 [1] : vector<8x32xf32> to vector<8xf32>
      %60 = vector.shape_cast %59 : vector<8xf32> to vector<8x1xf32>
      %cst_45 = arith.constant 0.0322580636 : f32
      %61 = vector.broadcast %cst_45 : f32 to vector<8x1xf32>
      %62 = arith.mulf %60, %61 : vector<8x1xf32>
      %63 = math.sqrt %62 : vector<8x1xf32>
      %cst_46 = arith.constant 9.99999997E-7 : f32
      %64 = vector.broadcast %cst_46 : f32 to vector<8x1xf32>
      %65 = arith.addf %63, %64 : vector<8x1xf32>
      %66 = tpu.reciprocal %65 {approx = true} : vector<8x1xf32> -> vector<8x1xf32>
      %67 = vector.broadcast %34 : vector<1x32xf32> to vector<8x32xf32>
      %68 = arith.mulf %67, %57 : vector<8x32xf32>
      %69 = vector.broadcast %66 : vector<8x1xf32> to vector<8x32xf32>
      %70 = arith.mulf %68, %69 : vector<8x32xf32>
      %71 = vector.broadcast %35 : vector<1x32xf32> to vector<8x32xf32>
      %72 = arith.addf %70, %71 : vector<8x32xf32>
      %73 = arith.truncf %72 : vector<8x32xf32> to vector<8x32xbf16>
      %cst_47 = arith.constant dense<0.000000e+00> : vector<8x32xf32>
      %74 = tpu.matmul %73, %43, %cst_47 {dimension_numbers = #tpu.dot_dimension_numbers<[1], [0], [0], [1], [0, 0, 1, 1], [], []>} : vector<8x32xbf16>, vector<32x32xbf16>, vector<8x32xf32> -> vector<8x32xf32>
      %75 = vector.broadcast %36 : vector<1x32xf32> to vector<8x32xf32>
      %76 = arith.addf %74, %75 : vector<8x32xf32>
      %cst_48 = arith.constant dense<0.000000e+00> : vector<8x32xf32>
      %77 = tpu.matmul %73, %45, %cst_48 {dimension_numbers = #tpu.dot_dimension_numbers<[1], [0], [0], [1], [0, 0, 1, 1], [], []>} : vector<8x32xbf16>, vector<32x32xbf16>, vector<8x32xf32> -> vector<8x32xf32>
      %78 = vector.broadcast %37 : vector<1x32xf32> to vector<8x32xf32>
      %79 = arith.addf %77, %78 : vector<8x32xf32>
      %cst_49 = arith.constant dense<0.000000e+00> : vector<8x32xf32>
      %80 = tpu.matmul %73, %47, %cst_49 {dimension_numbers = #tpu.dot_dimension_numbers<[1], [0], [0], [1], [0, 0, 1, 1], [], []>} : vector<8x32xbf16>, vector<32x32xbf16>, vector<8x32xf32> -> vector<8x32xf32>
      %81 = vector.broadcast %38 : vector<1x32xf32> to vector<8x32xf32>
      %82 = arith.addf %80, %81 : vector<8x32xf32>
      %83 = vector.extract_strided_slice %76 {offsets = [0, 0], sizes = [8, 8], strides = [1, 1]} : vector<8x32xf32> to vector<8x8xf32>
      %84 = vector.extract_strided_slice %76 {offsets = [0, 8], sizes = [8, 8], strides = [1, 1]} : vector<8x32xf32> to vector<8x8xf32>
      %85 = vector.extract_strided_slice %76 {offsets = [0, 16], sizes = [8, 8], strides = [1, 1]} : vector<8x32xf32> to vector<8x8xf32>
      %86 = vector.extract_strided_slice %76 {offsets = [0, 24], sizes = [8, 8], strides = [1, 1]} : vector<8x32xf32> to vector<8x8xf32>
      %87 = vector.shape_cast %83 : vector<8x8xf32> to vector<1x8x8xf32>
      %88 = vector.shape_cast %84 : vector<8x8xf32> to vector<1x8x8xf32>
      %89 = vector.shape_cast %85 : vector<8x8xf32> to vector<1x8x8xf32>
      %90 = vector.shape_cast %86 : vector<8x8xf32> to vector<1x8x8xf32>
      %91 = tpu.concatenate %87, %88, %89, %90 in 0 : vector<1x8x8xf32>, vector<1x8x8xf32>, vector<1x8x8xf32>, vector<1x8x8xf32> -> vector<4x8x8xf32>
      %92 = arith.truncf %91 : vector<4x8x8xf32> to vector<4x8x8xbf16>
      %93 = vector.extract_strided_slice %79 {offsets = [0, 0], sizes = [8, 8], strides = [1, 1]} : vector<8x32xf32> to vector<8x8xf32>
      %94 = vector.extract_strided_slice %79 {offsets = [0, 8], sizes = [8, 8], strides = [1, 1]} : vector<8x32xf32> to vector<8x8xf32>
      %95 = vector.extract_strided_slice %79 {offsets = [0, 16], sizes = [8, 8], strides = [1, 1]} : vector<8x32xf32> to vector<8x8xf32>
      %96 = vector.extract_strided_slice %79 {offsets = [0, 24], sizes = [8, 8], strides = [1, 1]} : vector<8x32xf32> to vector<8x8xf32>
      %97 = vector.shape_cast %93 : vector<8x8xf32> to vector<1x8x8xf32>
      %98 = vector.shape_cast %94 : vector<8x8xf32> to vector<1x8x8xf32>
      %99 = vector.shape_cast %95 : vector<8x8xf32> to vector<1x8x8xf32>
      %100 = vector.shape_cast %96 : vector<8x8xf32> to vector<1x8x8xf32>
      %101 = tpu.concatenate %97, %98, %99, %100 in 0 : vector<1x8x8xf32>, vector<1x8x8xf32>, vector<1x8x8xf32>, vector<1x8x8xf32> -> vector<4x8x8xf32>
      %102 = arith.truncf %101 : vector<4x8x8xf32> to vector<4x8x8xbf16>
      %103 = vector.extract_strided_slice %82 {offsets = [0, 0], sizes = [8, 8], strides = [1, 1]} : vector<8x32xf32> to vector<8x8xf32>
      %104 = vector.extract_strided_slice %82 {offsets = [0, 8], sizes = [8, 8], strides = [1, 1]} : vector<8x32xf32> to vector<8x8xf32>
      %105 = vector.extract_strided_slice %82 {offsets = [0, 16], sizes = [8, 8], strides = [1, 1]} : vector<8x32xf32> to vector<8x8xf32>
      %106 = vector.extract_strided_slice %82 {offsets = [0, 24], sizes = [8, 8], strides = [1, 1]} : vector<8x32xf32> to vector<8x8xf32>
      %107 = vector.shape_cast %103 : vector<8x8xf32> to vector<1x8x8xf32>
      %108 = vector.shape_cast %104 : vector<8x8xf32> to vector<1x8x8xf32>
      %109 = vector.shape_cast %105 : vector<8x8xf32> to vector<1x8x8xf32>
      %110 = vector.shape_cast %106 : vector<8x8xf32> to vector<1x8x8xf32>
      %111 = tpu.concatenate %107, %108, %109, %110 in 0 : vector<1x8x8xf32>, vector<1x8x8xf32>, vector<1x8x8xf32>, vector<1x8x8xf32> -> vector<4x8x8xf32>
      %112 = arith.truncf %111 : vector<4x8x8xf32> to vector<4x8x8xbf16>
      "tpu.trace_start"() <{level = 10 : i32, message = "hqd,hkd->hqk"}> : () -> ()
      %cst_50 = arith.constant dense<0.000000e+00> : vector<4x8x8xf32>
      %113 = tpu.matmul %92, %102, %cst_50 {dimension_numbers = #tpu.dot_dimension_numbers<[2], [2], [1], [1], [0, 0, 0, 1, 1, 1], [0], [0]>} : vector<4x8x8xbf16>, vector<4x8x8xbf16>, vector<4x8x8xf32> -> vector<4x8x8xf32>
      "tpu.trace_stop"() : () -> ()
      %cst_51 = arith.constant 0.353553385 : f32
      %114 = vector.broadcast %cst_51 : f32 to vector<4x8x8xf32>
      %115 = arith.mulf %113, %114 : vector<4x8x8xf32>
      %c0_52 = arith.constant 0 : index
      %c0_53 = arith.constant 0 : index
      %c0_54 = arith.constant 0 : index
      %116 = vector.load %arg4[%c0_52, %c0_53, %c0_54] : memref<1x1x8xf32, #tpu.memory_space<vmem>>, vector<1x1x8xf32>
      %117 = vector.shape_cast %116 : vector<1x1x8xf32> to vector<1x8xf32>
      %118 = vector.shape_cast %117 : vector<1x8xf32> to vector<1x1x8xf32>
      %119 = vector.broadcast %118 : vector<1x1x8xf32> to vector<4x8x8xf32>
      %120 = arith.addf %115, %119 : vector<4x8x8xf32>
      %cst_55 = arith.constant dense<0xFF800000> : vector<4x8xf32>
      %121 = vector.multi_reduction <maximumf>, %120, %cst_55 [2] : vector<4x8x8xf32> to vector<4x8xf32>
      %122 = vector.shape_cast %121 : vector<4x8xf32> to vector<4x8x1xf32>
      %123 = vector.broadcast %122 : vector<4x8x1xf32> to vector<4x8x8xf32>
      %124 = arith.subf %120, %123 : vector<4x8x8xf32>
      %125 = math.exp %124 : vector<4x8x8xf32>
      %cst_56 = arith.constant dense<0.000000e+00> : vector<4x8xf32>
      %126 = vector.multi_reduction <add>, %125, %cst_56 [2] : vector<4x8x8xf32> to vector<4x8xf32>
      %127 = vector.shape_cast %126 : vector<4x8xf32> to vector<4x8x1xf32>
      %128 = tpu.reciprocal %127 {approx = true} : vector<4x8x1xf32> -> vector<4x8x1xf32>
      %129 = vector.broadcast %128 : vector<4x8x1xf32> to vector<4x8x8xf32>
      %130 = arith.mulf %125, %129 : vector<4x8x8xf32>
      %131 = arith.truncf %130 : vector<4x8x8xf32> to vector<4x8x8xbf16>
      %c0_57 = arith.constant 0 : index
      %c0_58 = arith.constant 0 : index
      %c0_59 = arith.constant 0 : index
      %c0_60 = arith.constant 0 : index
      %132 = vector.load %arg14[%c0_57, %c0_58, %c0_59, %c0_60] : memref<1x4x8x8xbf16, #tpu.memory_space<vmem>>, vector<1x4x8x8xbf16>
      %133 = vector.shape_cast %132 : vector<1x4x8x8xbf16> to vector<4x8x8xbf16>
      %134 = vector.shape_cast %131 : vector<4x8x8xbf16> to vector<1x4x8x8xbf16>
      tpu.vector_store %arg14[%c0_57, %c0_58, %c0_59, %c0_60], %134 {strides = array<i32>} : memref<1x4x8x8xbf16, #tpu.memory_space<vmem>>, vector<1x4x8x8xbf16>,
      %135 = arith.truncf %130 : vector<4x8x8xf32> to vector<4x8x8xbf16>
      "tpu.trace_start"() <{level = 10 : i32, message = "hqk,hkd->hqd"}> : () -> ()
      %cst_61 = arith.constant dense<0.000000e+00> : vector<4x8x8xf32>
      %136 = tpu.matmul %135, %112, %cst_61 {dimension_numbers = #tpu.dot_dimension_numbers<[2], [1], [1], [2], [0, 0, 0, 1, 1, 2], [0], [0]>} : vector<4x8x8xbf16>, vector<4x8x8xbf16>, vector<4x8x8xf32> -> vector<4x8x8xf32>
      "tpu.trace_stop"() : () -> ()
      %137 = vector.extract_strided_slice %136 {offsets = [0, 0, 0], sizes = [1, 8, 8], strides = [1, 1, 1]} : vector<4x8x8xf32> to vector<1x8x8xf32>
      %138 = vector.shape_cast %137 : vector<1x8x8xf32> to vector<8x8xf32>
      %139 = vector.extract_strided_slice %136 {offsets = [1, 0, 0], sizes = [1, 8, 8], strides = [1, 1, 1]} : vector<4x8x8xf32> to vector<1x8x8xf32>
      %140 = vector.shape_cast %139 : vector<1x8x8xf32> to vector<8x8xf32>
      %141 = vector.extract_strided_slice %136 {offsets = [2, 0, 0], sizes = [1, 8, 8], strides = [1, 1, 1]} : vector<4x8x8xf32> to vector<1x8x8xf32>
      %142 = vector.shape_cast %141 : vector<1x8x8xf32> to vector<8x8xf32>
      %143 = vector.extract_strided_slice %136 {offsets = [3, 0, 0], sizes = [1, 8, 8], strides = [1, 1, 1]} : vector<4x8x8xf32> to vector<1x8x8xf32>
      %144 = vector.shape_cast %143 : vector<1x8x8xf32> to vector<8x8xf32>
      %145 = tpu.concatenate %138, %140, %142, %144 in 1 : vector<8x8xf32>, vector<8x8xf32>, vector<8x8xf32>, vector<8x8xf32> -> vector<8x32xf32>
      %146 = arith.truncf %145 : vector<8x32xf32> to vector<8x32xbf16>
      %cst_62 = arith.constant dense<0.000000e+00> : vector<8x32xf32>
      %147 = tpu.matmul %146, %49, %cst_62 {dimension_numbers = #tpu.dot_dimension_numbers<[1], [0], [0], [1], [0, 0, 1, 1], [], []>} : vector<8x32xbf16>, vector<32x32xbf16>, vector<8x32xf32> -> vector<8x32xf32>
      %148 = vector.broadcast %39 : vector<1x32xf32> to vector<8x32xf32>
      %149 = arith.addf %147, %148 : vector<8x32xf32>
      %150 = arith.addf %51, %149 : vector<8x32xf32>
      %c0_63 = arith.constant 0 : index
      %c0_64 = arith.constant 0 : index
      %c0_65 = arith.constant 0 : index
      %151 = vector.load %arg13[%c0_63, %c0_64, %c0_65] : memref<1x8x32xf32, #tpu.memory_space<vmem>>, vector<1x8x32xf32>
      %152 = vector.shape_cast %151 : vector<1x8x32xf32> to vector<8x32xf32>
      %153 = vector.shape_cast %150 : vector<8x32xf32> to vector<1x8x32xf32>
      tpu.vector_store %arg13[%c0_63, %c0_64, %c0_65], %153 {strides = array<i32>} : memref<1x8x32xf32, #tpu.memory_space<vmem>>, vector<1x8x32xf32>,
      %cst_66 = arith.constant dense<0.000000e+00> : vector<8xf32>
      %154 = vector.multi_reduction <add>, %150, %cst_66 [1] : vector<8x32xf32> to vector<8xf32>
      %155 = vector.shape_cast %154 : vector<8xf32> to vector<8x1xf32>
      %cst_67 = arith.constant 3.200000e+01 : f32
      %156 = vector.broadcast %cst_67 : f32 to vector<8x1xf32>
      %157 = arith.divf %155, %156 : vector<8x1xf32>
      %158 = vector.broadcast %157 : vector<8x1xf32> to vector<8x32xf32>
      %159 = arith.subf %150, %158 : vector<8x32xf32>
      %160 = arith.mulf %159, %159 : vector<8x32xf32>
      %cst_68 = arith.constant dense<0.000000e+00> : vector<8xf32>
      %161 = vector.multi_reduction <add>, %160, %cst_68 [1] : vector<8x32xf32> to vector<8xf32>
      %162 = vector.shape_cast %161 : vector<8xf32> to vector<8x1xf32>
      %cst_69 = arith.constant 0.0322580636 : f32
      %163 = vector.broadcast %cst_69 : f32 to vector<8x1xf32>
      %164 = arith.mulf %162, %163 : vector<8x1xf32>
      %165 = math.sqrt %164 : vector<8x1xf32>
      %cst_70 = arith.constant 9.99999997E-7 : f32
      %166 = vector.broadcast %cst_70 : f32 to vector<8x1xf32>
      %167 = arith.addf %165, %166 : vector<8x1xf32>
      %168 = tpu.reciprocal %167 {approx = true} : vector<8x1xf32> -> vector<8x1xf32>
      %169 = vector.broadcast %40 : vector<1x32xf32> to vector<8x32xf32>
      %170 = arith.mulf %169, %159 : vector<8x32xf32>
      %171 = vector.broadcast %168 : vector<8x1xf32> to vector<8x32xf32>
      %172 = arith.mulf %170, %171 : vector<8x32xf32>
      %173 = vector.broadcast %41 : vector<1x32xf32> to vector<8x32xf32>
      %174 = arith.addf %172, %173 : vector<8x32xf32>
      %175 = arith.truncf %174 : vector<8x32xf32> to vector<8x32xbf16>
      %c0_71 = arith.constant 0 : index
      %c0_72 = arith.constant 0 : index
      %c0_73 = arith.constant 0 : index
      %176 = vector.load %arg15[%c0_71, %c0_72, %c0_73] : memref<1x8x32xbf16, #tpu.memory_space<vmem>>, vector<1x8x32xbf16>
      %177 = vector.shape_cast %176 : vector<1x8x32xbf16> to vector<8x32xbf16>
      %178 = vector.shape_cast %175 : vector<8x32xbf16> to vector<1x8x32xbf16>
      tpu.vector_store %arg15[%c0_71, %c0_72, %c0_73], %178 {strides = array<i32>} : memref<1x8x32xbf16, #tpu.memory_space<vmem>>, vector<1x8x32xbf16>,
      %cst_74 = arith.constant 0.000000e+00 : f32
      %179 = vector.broadcast %cst_74 : f32 to vector<1x8x32xf32>
      %c0_75 = arith.constant 0 : index
      %c0_76 = arith.constant 0 : index
      %c0_77 = arith.constant 0 : index
      %180 = vector.load %arg16[%c0_75, %c0_76, %c0_77] : memref<1x8x32xf32, #tpu.memory_space<vmem>>, vector<1x8x32xf32>
      tpu.vector_store %arg16[%c0_75, %c0_76, %c0_77], %179 {strides = array<i32>} : memref<1x8x32xf32, #tpu.memory_space<vmem>>, vector<1x8x32xf32>,
    } else {
    }
    %c0 = arith.constant 0 : index
    %c0_4 = arith.constant 0 : index
    %c0_5 = arith.constant 0 : index
    %8 = vector.load %arg10[%c0, %c0_4, %c0_5] : memref<1x32x512xbf16, #tpu.memory_space<vmem>>, vector<1x32x512xbf16>
    %9 = vector.shape_cast %8 : vector<1x32x512xbf16> to vector<32x512xbf16>
    %c0_6 = arith.constant 0 : index
    %c0_7 = arith.constant 0 : index
    %c0_8 = arith.constant 0 : index
    %10 = vector.load %arg11[%c0_6, %c0_7, %c0_8] : memref<1x1x512xf32, #tpu.memory_space<vmem>>, vector<1x1x512xf32>
    %11 = vector.shape_cast %10 : vector<1x1x512xf32> to vector<1x512xf32>
    %c0_9 = arith.constant 0 : index
    %c0_10 = arith.constant 0 : index
    %c0_11 = arith.constant 0 : index
    %12 = vector.load %arg12[%c0_9, %c0_10, %c0_11] : memref<1x512x32xbf16, #tpu.memory_space<vmem>>, vector<1x512x32xbf16>
    %13 = vector.shape_cast %12 : vector<1x512x32xbf16> to vector<512x32xbf16>
    %c0_12 = arith.constant 0 : index
    %c0_13 = arith.constant 0 : index
    %c0_14 = arith.constant 0 : index
    %14 = vector.load %arg15[%c0_12, %c0_13, %c0_14] : memref<1x8x32xbf16, #tpu.memory_space<vmem>>, vector<1x8x32xbf16>
    %15 = vector.shape_cast %14 : vector<1x8x32xbf16> to vector<8x32xbf16>
    %cst = arith.constant dense<0.000000e+00> : vector<8x512xf32>
    %16 = tpu.matmul %15, %9, %cst {dimension_numbers = #tpu.dot_dimension_numbers<[1], [0], [0], [1], [0, 0, 1, 1], [], []>} : vector<8x32xbf16>, vector<32x512xbf16>, vector<8x512xf32> -> vector<8x512xf32>
    %17 = vector.broadcast %11 : vector<1x512xf32> to vector<8x512xf32>
    %18 = arith.addf %16, %17 : vector<8x512xf32>
    %cst_15 = arith.constant 0.000000e+00 : f32
    %19 = vector.broadcast %cst_15 : f32 to vector<8x512xf32>
    %20 = arith.maximumf %18, %19 : vector<8x512xf32>
    %c0_16 = arith.constant 0 : index
    %c0_17 = arith.constant 0 : index
    %c0_18 = arith.constant 0 : index
    %21 = vector.load %arg16[%c0_16, %c0_17, %c0_18] : memref<1x8x32xf32, #tpu.memory_space<vmem>>, vector<1x8x32xf32>
    %22 = vector.shape_cast %21 : vector<1x8x32xf32> to vector<8x32xf32>
    %23 = arith.truncf %20 : vector<8x512xf32> to vector<8x512xbf16>
    %cst_19 = arith.constant dense<0.000000e+00> : vector<8x32xf32>
    %24 = tpu.matmul %23, %13, %cst_19 {dimension_numbers = #tpu.dot_dimension_numbers<[1], [0], [0], [1], [0, 0, 1, 1], [], []>} : vector<8x512xbf16>, vector<512x32xbf16>, vector<8x32xf32> -> vector<8x32xf32>
    %25 = arith.addf %22, %24 : vector<8x32xf32>
    %c0_20 = arith.constant 0 : index
    %c0_21 = arith.constant 0 : index
    %c0_22 = arith.constant 0 : index
    %26 = vector.load %arg16[%c0_20, %c0_21, %c0_22] : memref<1x8x32xf32, #tpu.memory_space<vmem>>, vector<1x8x32xf32>
    %27 = vector.shape_cast %26 : vector<1x8x32xf32> to vector<8x32xf32>
    %28 = vector.shape_cast %25 : vector<8x32xf32> to vector<1x8x32xf32>
    tpu.vector_store %arg16[%c0_20, %c0_21, %c0_22], %28 {strides = array<i32>} : memref<1x8x32xf32, #tpu.memory_space<vmem>>, vector<1x8x32xf32>,
    %c3_i32 = arith.constant 3 : i32
    %29 = arith.cmpi eq, %arg2, %c3_i32 : i32
    %30 = arith.extui %29 : i1 to i32
    %c0_i32_23 = arith.constant 0 : i32
    %31 = arith.cmpi ne, %30, %c0_i32_23 : i32
    scf.if %31 {
      %c0_24 = arith.constant 0 : index
      %c8 = arith.constant 8 : index
      %c0_25 = arith.constant 0 : index
      %32 = vector.load %arg5[%c0_24, %c8, %c0_25] : memref<1x9x32xf32, #tpu.memory_space<vmem>>, vector<1x1x32xf32>
      %33 = vector.shape_cast %32 : vector<1x1x32xf32> to vector<1x32xf32>
      %c0_26 = arith.constant 0 : index
      %c0_27 = arith.constant 0 : index
      %c0_28 = arith.constant 0 : index
      %34 = vector.load %arg13[%c0_26, %c0_27, %c0_28] : memref<1x8x32xf32, #tpu.memory_space<vmem>>, vector<1x8x32xf32>
      %c0_29 = arith.constant 0 : index
      %c0_30 = arith.constant 0 : index
      %c0_31 = arith.constant 0 : index
      %35 = vector.load %arg16[%c0_29, %c0_30, %c0_31] : memref<1x8x32xf32, #tpu.memory_space<vmem>>, vector<1x8x32xf32>
      %36 = arith.addf %34, %35 : vector<1x8x32xf32>
      %37 = vector.shape_cast %33 : vector<1x32xf32> to vector<1x1x32xf32>
      %38 = vector.broadcast %37 : vector<1x1x32xf32> to vector<1x8x32xf32>
      %39 = arith.addf %36, %38 : vector<1x8x32xf32>
      %c0_32 = arith.constant 0 : index
      %c0_33 = arith.constant 0 : index
      %c0_34 = arith.constant 0 : index
      %40 = vector.load %arg13[%c0_32, %c0_33, %c0_34] : memref<1x8x32xf32, #tpu.memory_space<vmem>>, vector<1x8x32xf32>
      tpu.vector_store %arg13[%c0_32, %c0_33, %c0_34], %39 {strides = array<i32>} : memref<1x8x32xf32, #tpu.memory_space<vmem>>, vector<1x8x32xf32>,
    } else {
    }
    return
  }
  func.func @transform_0(%arg0: i32, %arg1: i32, %arg2: i32) -> (i32, i32, i32) {
    %c0_i32 = arith.constant 0 : i32
    %c0_i32_0 = arith.constant 0 : i32
    %c0_i32_1 = arith.constant 0 : i32
    return %arg0, %c0_i32, %c0_i32_0 : i32, i32, i32
  }
  func.func @transform_1(%arg0: i32, %arg1: i32, %arg2: i32) -> (i32, i32, i32) {
    %c0_i32 = arith.constant 0 : i32
    %c0_i32_0 = arith.constant 0 : i32
    %c0_i32_1 = arith.constant 0 : i32
    return %arg0, %c0_i32, %c0_i32_0 : i32, i32, i32
  }
  func.func @transform_2(%arg0: i32, %arg1: i32, %arg2: i32) -> (i32, i32, i32) {
    %c0_i32 = arith.constant 0 : i32
    %c0_i32_0 = arith.constant 0 : i32
    %c0_i32_1 = arith.constant 0 : i32
    return %arg1, %c0_i32, %c0_i32_0 : i32, i32, i32
  }
  func.func @transform_3(%arg0: i32, %arg1: i32, %arg2: i32) -> (i32, i32, i32) {
    %c0_i32 = arith.constant 0 : i32
    %c0_i32_0 = arith.constant 0 : i32
    %c0_i32_1 = arith.constant 0 : i32
    return %arg1, %c0_i32, %c0_i32_0 : i32, i32, i32
  }
  func.func @transform_4(%arg0: i32, %arg1: i32, %arg2: i32) -> (i32, i32, i32) {
    %c0_i32 = arith.constant 0 : i32
    %c0_i32_0 = arith.constant 0 : i32
    %c0_i32_1 = arith.constant 0 : i32
    return %arg1, %c0_i32, %c0_i32_0 : i32, i32, i32
  }
  func.func @transform_5(%arg0: i32, %arg1: i32, %arg2: i32) -> (i32, i32, i32) {
    %c0_i32 = arith.constant 0 : i32
    %c0_i32_0 = arith.constant 0 : i32
    %c0_i32_1 = arith.constant 0 : i32
    return %arg1, %c0_i32, %c0_i32_0 : i32, i32, i32
  }
  func.func @transform_6(%arg0: i32, %arg1: i32, %arg2: i32) -> (i32, i32, i32) {
    %c0_i32 = arith.constant 0 : i32
    %c0_i32_0 = arith.constant 0 : i32
    %c0_i32_1 = arith.constant 0 : i32
    return %arg1, %c0_i32, %c0_i32_0 : i32, i32, i32
  }
  func.func @transform_7(%arg0: i32, %arg1: i32, %arg2: i32) -> (i32, i32, i32) {
    %c0_i32 = arith.constant 0 : i32
    %c0_i32_0 = arith.constant 0 : i32
    return %arg1, %c0_i32, %arg2 : i32, i32, i32
  }
  func.func @transform_8(%arg0: i32, %arg1: i32, %arg2: i32) -> (i32, i32, i32) {
    %c0_i32 = arith.constant 0 : i32
    %c0_i32_0 = arith.constant 0 : i32
    return %arg1, %c0_i32, %arg2 : i32, i32, i32
  }
  func.func @transform_9(%arg0: i32, %arg1: i32, %arg2: i32) -> (i32, i32, i32) {
    %c0_i32 = arith.constant 0 : i32
    %c0_i32_0 = arith.constant 0 : i32
    return %arg1, %arg2, %c0_i32 : i32, i32, i32
  }
  func.func @transform_10(%arg0: i32, %arg1: i32, %arg2: i32) -> (i32, i32, i32) {
    %c0_i32 = arith.constant 0 : i32
    %c0_i32_0 = arith.constant 0 : i32
    %c0_i32_1 = arith.constant 0 : i32
    return %arg0, %c0_i32, %c0_i32_0 : i32, i32, i32
  }
  func.func @transform_11(%arg0: i32, %arg1: i32, %arg2: i32) -> (i32, i32, i32, i32) {
    %c2_i32 = arith.constant 2 : i32
    %0 = arith.muli %arg1, %c2_i32 : i32
    %1 = arith.addi %0, %arg0 : i32
    %c0_i32 = arith.constant 0 : i32
    %c0_i32_0 = arith.constant 0 : i32
    %c0_i32_1 = arith.constant 0 : i32
    %c0_i32_2 = arith.constant 0 : i32
    return %1, %c0_i32, %c0_i32_0, %c0_i32_1 : i32, i32, i32, i32
  }
}

</mosaic_0001>

<bundles_post_ra>
// kernel: encoder_forward.2
= control target key start
LH: loop header
LB: loop body
LE: loop exit
PB: predicated region body
PF: predicated region fallthrough
CT: control target
= control target key end

     0   :  { %s497_s15 = smov 0   ;;  %s499_s16 = smov 0   ;;  %s542_s0 = inlined_call_operand.vmem [shape: bf16[2,8,16], index: 0, kind: input, shape index: {}]   ;;  %s543_s1 = inlined_call_operand.vmem [shape: f32[8,32], index: 1, kind: input, shape index: {}]   ;;  %s544_s2 = inlined_call_operand.vmem [shape: bf16[16,32], index: 2, kind: input, shape index: {}]   ;;  %s545_s3 = inlined_call_operand.vmem [shape: f32[1,32], index: 3, kind: input, shape index: {}]   ;;  %s546_s4 = inlined_call_operand.vmem [shape: f32[2,8,32], index: 4, kind: output, shape index: {}]  }
   0x1   :  { %s501_s17 = smov 0  }
   0x2 LB: > { %s26_s18 = sadd.s32 1, %s464_s16  ;;  %p403_p0 = scmp.ge.s32.totalorder %s468_s17, 1  ;;  %s468_s17 = sphi %s501_s17, %s14_s17   ;;  %s464_s16 = sphi %s499_s16, %s548_s16   ;;  %s460_s15 = sphi %s497_s15, %s547_s15  }
   0x3   : > { %p28_p1 = scmp.ge.s32.totalorder %s26_s18, 2  ;;  %p189_p2 = scmp.lt.s32.totalorder %s468_s17, 3 }
   0x5   : > { %s550_s18 = smov (%p28_p1, %s26_s18), 0  ;;  %p190_p3 = pnand %p403_p0, %p189_p2 }
   0x6   : > { %p221_p4 = scmp.lt.s32.totalorder (!%p190_p3), %s460_s15, 1 }
   0x7   : > { %193 = sbr.rel (%p190_p3) target bundleno = 227 (0xe3), region = 36 }
   0xc   : > { %v445_v0 = vld [vmem:[%s544_s2] sm:$0xff]   ;;  %v470_v1 = vmov 0.0   ;;  %s552_s15 = smov (!%p221_p4, %s460_s15), 1  ;;  %vm471_vm0 = vmmov 0   ;;  %vm243_vm1 = vcmask 261120   ;;  %vm255_vm2 = vcmask 130048  }
   0xd   : > { %413 = vmatprep.subr.bf16.mxu0 %v470_v1  ;;  %415 = vmatprep.mubr.msk.bf16.mxu0 %vm471_vm0, %v470_v1  ;;  %s405_s21 = sshll.u32 %s552_s15, 3  ;;  %s404_s22 = sshll.u32 %s552_s15, 2  ;;  %v408_v9 = vld [vmem:[%s545_s3] ss:$0 sm:$0xff] }
   0xe   : > { %414 = vmatpush3.bf16.msra.mxu0 %v445_v0  ;;  %s237_s25 = scalar_lea.vmem %s546_s4, %s405_s21  ;;  %s227_s28 = scalar_lea.vmem %s542_s0, %s404_s22  ;;  %v315_v12 = vld [vmem:[%s543_s1] sm:$0xff] }
   0xf   : > { %244 = vst.msk [vmem:[%s237_s25] sm:$0xff] %vm243_vm1, %v470_v1  ;;  %v246_v2 = vld [vmem:[%s227_s28] sm:$0xf] }
  0x11   : > { %416 = vmatmul.mubr.msk.bf16.vlgmr.msra.gmra.mxu0 %vm255_vm2, %v246_v2 }
  0x16   : > { %v245_v3 = vld [vmem:[%s237_s25] sm:$0xff] }
  0xd1   : > { %v293_v4 = vpop.f32.mrf.mxu0 }
  0xd2   : > { %v299_v5 = vadd.f32 %v293_v4, %v245_v3 }
  0xd3   : > { %v417_v6 = vpop.f32.mrf.mxu0 }
  0xd4   : > { %301 = vst.msk [vmem:[%s237_s25] sm:$0xff] %vm243_vm1, %v299_v5 }
  0xd5   : > { %v296_v7 = vpop.f32.mrf.mxu0 }
  0xd7   : > { %v418_v8 = vpop.f32.mrf.mxu0 }
  0xdb   : > { %v305_v10 = vld [vmem:[%s237_s25] sm:$0xff] }
  0xdc   : > { %v313_v11 = vadd.f32 %v408_v9, %v305_v10 }
  0xde   : > { %v314_v13 = vmul.f32 5.656854, %v313_v11 }
  0xe0   : > { %v316_v14 = vadd.f32 %v315_v12, %v314_v13 }
  0xe2   : > { %317 = vst.msk [vmem:[%s237_s25] sm:$0xff] %vm243_vm1, %v316_v14 }
  0xe3 PF: > { %s14_s17 = sadd.s32 1, %s468_s17   ;;  %s547_s15 = smov %s464_s16 }
  0xe4   : > { %p11_p5 = scmp.ge.s32.totalorder %s14_s17, 4   ;;  %s548_s16 = smov %s550_s18 }
  0xe6   :  { %13 = sbr.rel (!%p11_p5) target bundleno = 2 (0x2), region = 77 }

// kernel: encoder_forward.3
= control target key start
LH: loop header
LB: loop body
LE: loop exit
PB: predicated region body
PF: predicated region fallthrough
CT: control target
= control target key end

     0   :  { %s3167_s0 = inlined_call_operand.vmem [shape: f32[2,8,32], index: 0, kind: input, shape index: {}, may-alias: {0,10}]   ;;  %s3168_s1 = inlined_call_operand.vmem [shape: f32[2,1,8], index: 1, kind: input, shape index: {}]   ;;  %s3169_s2 = inlined_call_operand.vmem [shape: f32[2,9,32], index: 2, kind: input, shape index: {}]   ;;  %s3170_s3 = inlined_call_operand.vmem [shape: bf16[2,32,32], index: 3, kind: input, shape index: {}]   ;;  %s3171_s4 = inlined_call_operand.vmem [shape: bf16[2,32,32], index: 4, kind: input, shape index: {}]   ;;  %s3172_s5 = inlined_call_operand.vmem [shape: bf16[2,32,32], index: 5, kind: input, shape index: {}]   ;;  %s3173_s6 = inlined_call_operand.vmem [shape: bf16[2,32,32], index: 6, kind: input, shape index: {}]   ;;  %s3174_s7 = inlined_call_operand.vmem [shape: bf16[2,32,2048], index: 7, kind: input, shape index: {}]   ;;  %s3175_s8 = inlined_call_operand.vmem [shape: f32[2,1,2048], index: 8, kind: input, shape index: {}]   ;;  %s3176_s9 = inlined_call_operand.vmem [shape: bf16[2,2048,32], index: 9, kind: input, shape index: {}]   ;;  %s3177_s10 = inlined_call_operand.vmem [shape: f32[2,8,32], index: 10, kind: output, shape index: {0}, may-alias: {0,10}]   ;;  %s3178_s11 = inlined_call_operand.vmem [shape: bf16[4,4,8,8], index: 11, kind: output, shape index: {1}]  }
   0x1   :  { %3187 = sst [smem:[#allocation15_spill]] %s3167_s0 }
   0x2   :  { %3188 = sst [smem:[#allocation16_spill]] %s3169_s2 }
   0x3   :  { %3189 = sst [smem:[#allocation17_spill]] %s3170_s3 }
   0x4   :  { %3190 = sst [smem:[#allocation18_spill]] %s3171_s4 }
   0x5   :  { %3191 = sst [smem:[#allocation19_spill]] %s3172_s5 }
   0x6   :  { %3192 = sst [smem:[#allocation20_spill]] %s3173_s6 }
   0x7   :  { %3193 = sst [smem:[#allocation21_spill]] %s3174_s7 }
   0x8   :  { %3194 = sst [smem:[#allocation22_spill]] %s3176_s9 }
   0x9   :  { %3195 = sst [smem:[#allocation23_spill]] %s3178_s11 }
   0xa   :  { %s2801_s17 = smov 0   ;;  %s2803_s18 = smov 0  }
   0xb   :  { %s2805_s19 = smov 0   ;;  %s2807_s20 = smov 0  }
   0xc   :  { %s2809_s21 = smov 0   ;;  %s2811_s22 = smov 0  }
   0xd   :  { %s2813_s23 = smov 0   ;;  %s2815_s24 = smov 0  }
   0xe   :  { %s2817_s25 = smov 0  }
   0xf LB: > { %3196 = sst [smem:[#allocation5_spill]] %s2702_s18  ;;  %s34_s26 = sadd.s32 1, %s2718_s22  ;;  %s2730_s25 = sphi %s2817_s25, %s22_s25   ;;  %s2726_s24 = sphi %s2815_s24, %s3225_s24   ;;  %s2722_s23 = sphi %s2813_s23, %s3224_s23   ;;  %s2718_s22 = sphi %s2811_s22, %s3223_s22   ;;  %s2714_s21 = sphi %s2809_s21, %s3222_s21   ;;  %s2710_s20 = sphi %s2807_s20, %s3221_s20   ;;  %s2706_s19 = sphi %s2805_s19, %s3220_s19   ;;  %s2702_s18 = sphi %s2803_s18, %s3219_s18   ;;  %s2698_s17 = sphi %s2801_s17, %s3218_s17  }
  0x10   : > { %3197 = sst [smem:[#allocation6_spill]] %s2718_s22  ;;  %p35_p0 = scmp.ge.s32.totalorder %s34_s26, 4 }
  0x11   : > { %3198 = sst [smem:[#allocation7_spill]] %s2722_s23  ;;  %s37_s27 = sadd.s32 1, %s2722_s23 }
  0x12   : > { %3199 = sst [smem:[#allocation8_spill]] %s2726_s24  ;;  %p239_p1 = scmp.ne.s32.totalorder %s2702_s18, %s2698_s17 }
  0x13   : > { %3200 = sst [smem:[#allocation9_spill]] %s2730_s25  ;;  %s3227_s26 = smov (%p35_p0, %s34_s26), 0 }
  0x14   : > { %3201 = sst [smem:[#allocation10_spill]] %s3227_s26  ;;  %s3229_s27 = smov (!%p35_p0, %s37_s27), %s2722_s23 }
  0x15   : > { %p240_p2 = scmp.eq.s32.totalorder %s2730_s25, 0  ;;  %p39_p3 = scmp.ge.s32.totalorder %s3229_s27, 2 }
  0x16   : > { %s41_s28 = sadd.s32 1, %s2726_s24  ;;  %s228_s29 = ssub.s32 %s2718_s22, %s3227_s26 }
  0x17   : > { %p241_p4 = por %p240_p2, %p239_p1  ;;  %s3231_s27 = smov (%p39_p3, %s3229_s27), 0 }
  0x18   : > { %3202 = sst [smem:[#allocation11_spill]] %s3231_s27  ;;  %s3233_s28 = smov (!%p39_p3, %s41_s28), %s2726_s24 }
  0x19   : > { %s227_s30 = ssub.s32 %s2722_s23, %s3231_s27  ;;  %s232_s12 = sadd.s32 1, %s2702_s18 }
  0x1a   : > { %p43_p5 = scmp.ge.s32.totalorder %s3233_s28, 2  ;;  %s229_s13 = sor.u32 %s228_s29, %s227_s30 }
  0x1b   : > { %p230_p6 = scmp.eq.s32.totalorder %s229_s13, 0  ;;  %p2250_p7 = scmp.ge.s32.totalorder %s2730_s25, 16 }
  0x1c   : > { %s3235_s28 = smov (%p43_p5, %s3233_s28), 0 }
  0x1d   : > { %3203 = sst [smem:[#allocation12_spill]] %s3235_s28  ;;  %377 = sbr.rel (%p2250_p7) target bundleno = 48 (0x30), region = 16 }
  0x1e   : > { %s2866_s14 = scalar_select %p230_p6, %s2702_s18, %s232_s12  }
  0x20   : > { %3204 = sst [smem:[#allocation13_spill]] %s2866_s14 }
  0x22   : > { %433 = sbr.rel (!%p241_p4) target bundleno = 48 (0x30), region = 48  ;;  %s435_s15 = sand.u32 (%p241_p4), 1, %s2702_s18  }
  0x23   : > { %s2252_s16 = sshll.u32 (%p241_p4), %s2718_s22, 2  ;;  %s2251_s26 = sshll.u32 (%p241_p4), %s435_s15, 6 }
  0x24   : > { %s2253_s24 = sshll.u32 (%p241_p4), %s2722_s23, 6  ;;  %s3205_s7 = sld [smem:[#allocation21_spill]] (%p241_p4) }
  0x25   : > { %s440_s27 = sadd.s32 (%p241_p4), %s2253_s24, %s2252_s16  ;;  %s437_s12 = scalar_lea.vmem (%p241_p4), [#allocation4], %s2251_s26 }
  0x26   : > { %s2254_s11 = sshll.u32 (%p241_p4), %s440_s27, 2 }
  0x2a   : > { %s442_s30 = scalar_lea.vmem %s3205_s7, %s2254_s11 }
  0x2b   : > { %v455_v0 = vld [vmem:[%s442_s30] sm:$0xff]  ;;  %v457_v1 = vld [vmem:[%s442_s30 + $0x8] sm:$0xff] }
  0x2c   : > { %v459_v2 = vld [vmem:[%s442_s30 + $0x40] sm:$0xff]  ;;  %456 = vst [vmem:[%s437_s12] sm:$0xff] %v455_v0  ;;  %458 = vst [vmem:[%s437_s12 + $0x8] sm:$0xff] %v457_v1  ;;  %v461_v3 = vld [vmem:[%s442_s30 + $0x48] sm:$0xff] }
  0x2d   : > { %460 = vst [vmem:[%s437_s12 + $0x10] sm:$0xff] %v459_v2  ;;  %v463_v4 = vld [vmem:[%s442_s30 + $0x80] sm:$0xff]  ;;  %v465_v5 = vld [vmem:[%s442_s30 + $0x88] sm:$0xff]  ;;  %462 = vst [vmem:[%s437_s12 + $0x18] sm:$0xff] %v461_v3 }
  0x2e   : > { %464 = vst [vmem:[%s437_s12 + $0x20] sm:$0xff] %v463_v4  ;;  %466 = vst [vmem:[%s437_s12 + $0x28] sm:$0xff] %v465_v5  ;;  %v467_v6 = vld [vmem:[%s442_s30 + $0xc0] sm:$0xff]  ;;  %v469_v7 = vld [vmem:[%s442_s30 + $0xc8] sm:$0xff] }
  0x2f   : > { %468 = vst [vmem:[%s437_s12 + $0x30] sm:$0xff] %v467_v6  ;;  %470 = vst [vmem:[%s437_s12 + $0x38] sm:$0xff] %v469_v7 }
  0x30 PF: > { %p2255_p8 = scmp.ge.s32.totalorder %s2730_s25, 1  ;;  %p500_p9 = scmp.lt.s32.totalorder %s2730_s25, 17 }
  0x32   : > { %p501_p10 = pnand %p2255_p8, %p500_p9 }
  0x34   : > { %504 = sbr.rel (%p501_p10) target bundleno = 2567 (0xa07), region = 79 }
  0x39   : > { %s507_s9 = sand.u32 1, %s2698_s17   ;;  %p601_p11 = scmp.lt.s32.totalorder %s2714_s21, 1 }
  0x3a   : > { %s2879_s11 = sshll.u32 %s507_s9, 6  ;;  %p608_p12 = scmp.lt.s32.totalorder %s2710_s20, 1 }
  0x3b   : > { %s2268_s24 = sshll.u32 %s2706_s19, 2  ;;  %s3206_s0 = sld [smem:[#allocation15_spill]] }
  0x3c   : > { %s2884_s26 = scalar_select %p601_p11, %s2714_s21, 1 }
  0x3d   : > { %s609_s27 = scalar_select %p608_p12, %s2710_s20, 1 }
  0x3e   : > { %s2257_s13 = sshll.u32 %s2884_s26, 3  ;;  %s3207_s2 = sld [smem:[#allocation16_spill]] }
  0x3f   : > { %s2345_s9 = sshll.u32 %s609_s27, 4  ;;  %s3208_s3 = sld [smem:[#allocation17_spill]] }
  0x40   : > { %s3209_s4 = sld [smem:[#allocation18_spill]]  ;;  %p637_p13 = scmp.lt.s32.totalorder %s2268_s24, 15 }
  0x41   : > { %s604_s17 = scalar_lea.vmem %s3206_s0, %s2257_s13  ;;  %s3210_s5 = sld [smem:[#allocation19_spill]] }
  0x42   : > { %s3211_s6 = sld [smem:[#allocation20_spill]]  ;;  %s2270_s22 = sshll.u32 %s2706_s19, 6 }
  0x43   : > { %s2271_s14 = sshll.u32 %s609_s27, 8  ;;  %s3237_s24 = smov (!%p637_p13, %s2268_s24), 15 }
  0x44   : > { %s2898_s23 = scalar_lea.vmem %s3207_s2, %s2345_s9  ;;  %p646_p0 = scmp.lt.s32.totalorder %s2270_s22, 255 }
  0x45   : > { %s2903_s18 = scalar_lea.vmem %s3208_s3, %s2345_s9  ;;  %s2924_s2 = scalar_lea.vmem %s3177_s10, %s2257_s13 }
  0x46   : > { %s2908_s16 = scalar_lea.vmem %s3209_s4, %s2345_s9  ;;  %s640_s30 = sadd.s32 %s2345_s9, %s3237_s24 }
  0x47   : > { %s2913_s29 = scalar_lea.vmem %s3210_s5, %s2345_s9  ;;  %s2274_s12 = sshll.u32 %s2710_s20, 1 }
  0x48   : > { %s2918_s28 = scalar_lea.vmem %s3211_s6, %s2345_s9  ;;  %s2930_s0 = scalar_lea.vmem %s3175_s8, %s640_s30 }
  0x49   : > { %3212 = sst [smem:[#allocation14_spill]] %s2918_s28  ;;  %s658_s7 = sadd.s32 %s2714_s21, %s2274_s12 }
  0x4a   : > { %s3239_s22 = smov (!%p646_p0, %s2270_s22), 255  ;;  %p659_p1 = scmp.lt.s32.totalorder %s658_s7, 3 }
  0x4b   : > { %p667_p2 = scmp.eq.s32.totalorder %s2710_s20, 0  ;;  %s649_s27 = sadd.s32 %s2271_s14, %s3239_s22 }
  0x4c   : > { %p668_p3 = scmp.eq.s32.totalorder %s2706_s19, 0  ;;  %s2272_s5 = sshll.u32 %s649_s27, 2 }
  0x4d   : > { %s3213_s25 = sld [smem:[#allocation22_spill]]  ;;  %s3241_s7 = smov (!%p659_p1, %s658_s7), 3 }
  0x4e   : > { %p669_p4 = pnand %p668_p3, %p667_p2  ;;  %s2350_s24 = sshll.u32 %s3241_s7, 4 }
  0x4f   : > { %s3214_s3 = sld [smem:[#allocation23_spill]]  ;;  %s2946_s21 = scalar_lea.vmem [#allocation4], %s2879_s11 }
  0x51   : > { %672 = sbr.rel (%p669_p4) target bundleno = 88 (0x58), region = 87 }
  0x53   : > { %s2938_s13 = scalar_lea.vmem %s3213_s25, %s2272_s5 }
  0x55   : > { %s2943_s4 = scalar_lea.vmem %s3214_s3, %s2350_s24 }
  0x56   : > { %v673_v8 = vld [vmem:[%s604_s17] sm:$0xff]  ;;  %vm674_vm0 = vcmask 261120  }
  0x57   : > { %675 = vst.msk [vmem:[%s2924_s2] sm:$0xff] %vm674_vm0, %v673_v8 }
  0x58 PF: > { %p2277_p5 = scmp.ne.s32.totalorder %s2706_s19, 0 }
  0x59   : > { %s2734_s5 = smov (!%p2277_p5), 120   ;;  %s2735_s6 = smov (!%p2277_p5), 112  }
  0x5a   : > { %678 = sbr.rel (%p2277_p5) target bundleno = 2141 (0x85d), region = 91  ;;  %s2737_s17 = smov (!%p2277_p5), 8  }
  0x5b   : > { %s2739_s28 = smov (!%p2277_p5), 24  }
  0x5f   : > { %v2951_v9 = vld [vmem:[%s2924_s2] sm:$0xff]  ;;  %vm697_vm1 = vcmask 261120   ;;  %v2732_v11 = vmov 0.0   ;;  %v2584_v17 = vld [vmem:[%s2903_s18 + $0x8] sm:$0xff]   ;;  %vm2733_vm2 = vmmov 0   ;;  %v718_v26 = vlaneseq }
  0x60   : > { %v698_v10 = vsel %vm697_vm1, %v2951_v9, 0.0  ;;  %1493 = vst.msk [vmem:[#allocation3] sm:$0xff] %vm697_vm1, %v2732_v11  ;;  %2423 = vmatprep.subr.bf16.mxu0 %v2732_v11  ;;  %2431 = vmatprep.subr.bf16.mxu1 %v2732_v11  ;;  %v2585_v18 = vld [vmem:[%s2908_s16 + $0x8] sm:$0xff]   ;;  %v2586_v19 = vld [vmem:[%s2903_s18] sm:$0xff]   ;;  %vm943_vm5 = vcmask 64512   ;;  %s2736_s18 = smov 104  }
  0x61   : > { %699 = vadd.xlane.f32.xlu0 %v698_v10  ;;  %2427 = vmatprep.mubr.msk.bf16.mxu0 %vm2733_vm2, %v2732_v11  ;;  %v2587_v20 = vld [vmem:[%s2908_s16] sm:$0xff]   ;;  %v2973_v30 = vshrl.u32 %v718_v26, 7  ;;  %v2588_v40 = vld [vmem:[%s2913_s29 + $0x8] sm:$0xff]   ;;  %vm1199_vm6 = vcmask 1043456   ;;  %vm1191_vm7 = vcmask 60416   ;;  %s2738_s16 = smov 16  }
  0x62   : > { %2435 = vmatprep.mubr.msk.bf16.mxu1 %vm2733_vm2, %v2732_v11  ;;  %2424 = vmatpush3.bf16.msra.mxu0 %v2584_v17  ;;  %v2977_v32 = vld [vmem:[%s2898_s23] sm:$0xff]  ;;  %vm1394_vm8 = vcmask 130048   ;;  %vm1396_vm9 = vcmask 195584   ;;  %vm1491_vm12 = vcmask 257024  }
  0x63   : > { %2432 = vmatpush3.bf16.msra.mxu1 %v2585_v18  ;;  %2425 = vmatprep.subr.bf16.mxu0 %v2732_v11  ;;  %v720_v31 = vsub.s32 0, %v2973_v30  ;;  %v726_v34 = vsub.s32 1, %v2973_v30  ;;  %v2589_v42 = vld [vmem:[%s2913_s29] sm:$0xff]   ;;  %v732_v43 = vsub.s32 2, %v2973_v30  ;;  %v791_v44 = vsub.s32 3, %v2973_v30  ;;  %s3215_s29 = scalar_lea.vmem %s3168_s1, %s2884_s26  ;;  %s3216_s26 = sld [smem:[#allocation14_spill]] }
  0x64   : > { %2433 = vmatprep.subr.bf16.mxu1 %v2732_v11  ;;  %v847_v0 = vsub.s32 4, %v2973_v30 }
  0x65   : > { %v721_v33 = vrot.slane %v2977_v32, %v720_v31  ;;  %v727_v36 = vrot.slane %v2977_v32, %v726_v34  ;;  %v733_v45 = vrot.slane %v2977_v32, %v732_v43  ;;  %v792_v46 = vrot.slane %v2977_v32, %v791_v44 }
  0x66   : > { %2426 = vmatpush3.bf16.msra.mxu0 %v2586_v19  ;;  %v848_v3 = vrot.slane %v2977_v32, %v847_v0 }
  0x67   : > { %2434 = vmatpush3.bf16.msra.mxu1 %v2587_v20  ;;  %2439 = vmatprep.subr.bf16.mxu0 %v2732_v11 }
  0x68   : > { %2447 = vmatprep.subr.bf16.mxu1 %v2732_v11 }
  0xea   : > { %v700_v12 = vpop.xlane.xlu0 %699 }
  0xeb   : > { %v702_v13 = vmul.f32 0.03125, %v700_v12 }
  0xed   : > { %v703_v14 = vsub.f32 %v2951_v9, %v702_v13 }
  0xef   : > { %v704_v15 = vmul.f32 %v703_v14, %v703_v14  ;;  %v722_v35 = vmul.f32 %v721_v33, %v703_v14 }
  0xf1   : > { %v705_v16 = vsel %vm697_vm1, %v704_v15, 0.0 }
  0xf2   : > { %706 = vadd.xlane.f32.xlu0 %v705_v16 }
 0x17b   : > { %v707_v21 = vpop.xlane.xlu0 %706 }
 0x17c   : > { %v708_v22 = vmul.f32 0.032258064, %v707_v21 }
 0x17e   : > { %2592 = vrsqrt.f32 %v708_v22  ;;  %vm711_vm3 = vcmp.eq.f32.partialorder %v708_v22, inf  ;;  %v714_v25 = vand.u32 2147483648, %v708_v22  ;;  %vm713_vm4 = vcmp.eq.f32.partialorder %v708_v22, 0.0 }
 0x18b   : > { %v2593_v23 = vpop.eup %2592 }
 0x18c   : > { %v710_v24 = vmul.f32 %v2593_v23, %v708_v22  ;;  %v2291_v23 = vld [vmem:[%s3215_s29] ss:$0 sm:$0xff] }
 0x18e   : > { %v712_v27 = vsel %vm711_vm3, %v708_v22, %v710_v24 }
 0x18f   : > { %v715_v28 = vsel %vm713_vm4, %v714_v25, %v712_v27 }
 0x190   : > { %v716_v29 = vadd.f32 1e-06, %v715_v28 }
 0x192   : > { %2594 = vrcp.f32 %v716_v29 }
 0x19f   : > { %v2595_v37 = vpop.eup %2594 }
 0x1a0   : > { %v723_v38 = vmul.f32 %v2595_v37, %v722_v35 }
 0x1a2   : > { %v728_v39 = vadd.f32 %v727_v36, %v723_v38 }
 0x1a4   : > { %v729_v41 = vpack.c.bf16 %v728_v39, %v728_v39 }
 0x1a6   : > { %2428 = vmatmul.mubr.msk.bf16.vlgmr.msra.gmra.mxu0 %vm697_vm1, %v729_v41  ;;  %2436 = vmatmul.mubr.msk.bf16.vlgmr.msra.gmra.mxu1 %vm697_vm1, %v729_v41 }
 0x1a7   : > { %2440 = vmatpush3.bf16.msra.mxu0 %v2588_v40  ;;  %2443 = vmatprep.mubr.msk.bf16.mxu0 %vm2733_vm2, %v2732_v11 }
 0x1a8   : > { %2441 = vmatprep.subr.bf16.mxu0 %v2732_v11  ;;  %2449 = vmatprep.mubr.msk.bf16.mxu1 %vm2733_vm2, %v2732_v11 }
 0x1ab   : > { %2442 = vmatpush3.bf16.msra.mxu0 %v2589_v42 }
 0x1ac   : > { %2453 = vmatprep.subr.bf16.mxu0 %v2732_v11 }
 0x1ae   : > { %2444 = vmatmul.mubr.msk.bf16.vlgmr.msra.gmra.mxu0 %vm697_vm1, %v729_v41 }
 0x1af   : > { %2455 = vmatprep.mubr.msk.bf16.mxu0 %vm2733_vm2, %v2732_v11 }
 0x266   : > { %v783_v47 = vpop.f32.mrf.mxu0  ;;  %v839_v48 = vpop.f32.mrf.mxu1 }
 0x267   : > { %v784_v49 = vadd.f32 %v783_v47, %v733_v45  ;;  %v840_v50 = vadd.f32 %v839_v48, %v792_v46 }
 0x268   : > { %v2429_v51 = vpop.f32.mrf.mxu0  ;;  %v2437_v52 = vpop.f32.mrf.mxu1 }
 0x269   : > { %916 = vrot.lane.b32.xlu1 %v840_v50, %s2734_s5  ;;  %902 = vrot.lane.b32.xlu0 %v784_v49, %s2734_s5  ;;  %v925_v53 = vpack.c.bf16 %v840_v50, %v840_v50  ;;  %v911_v61 = vpack.c.bf16 %v784_v49, %v784_v49 }
 0x26a   : > { %v786_v54 = vpop.f32.mrf.mxu0  ;;  %v842_v55 = vpop.f32.mrf.mxu1 }
 0x26b   : > { %v948_v56 = vsel %vm943_vm5, %v925_v53, 0 }
 0x26c   : > { %v2430_v57 = vpop.f32.mrf.mxu0  ;;  %v2438_v58 = vpop.f32.mrf.mxu1  ;;  %2448 = vmatpush3.bf16.xpose.msra.mxu1 %v948_v56 }
 0x26d   : > { %919 = vrot.lane.b32.xlu1 %v840_v50, %s2735_s6  ;;  %2459 = vmatprep.subr.bf16.mxu1 %v2732_v11 }
 0x26e   : > { %v895_v59 = vpop.f32.mrf.mxu0 }
 0x26f   : > { %v3014_v8 = vadd.f32 %v895_v59, %v848_v3 }
 0x270   : > { %v2445_v60 = vpop.f32.mrf.mxu0 }
 0x271   : > { %922 = vrot.lane.b32.xlu1 %v840_v50, %s2736_s18  ;;  %v939_v16 = vpack.c.bf16 %v3014_v8, %v3014_v8 }
 0x272   : > { %v898_v62 = vpop.f32.mrf.mxu0 }
 0x273   : > { %2450 = vmatmul.mubr.msk.bf16.vlgmr.msra.gmra.mxu1 %vm943_vm5, %v911_v61  ;;  %v1201_v19 = vsel %vm1199_vm6, %v939_v16, 0 }
 0x274   : > { %v2446_v63 = vpop.f32.mrf.mxu0  ;;  %2461 = vmatprep.mubr.msk.bf16.mxu1 %vm2733_vm2, %v2732_v11 }
 0x275   : > { %905 = vrot.lane.b32.xlu1 %v784_v49, %s2735_s6 }
 0x279   : > { %908 = vrot.lane.b32.xlu1 %v784_v49, %s2736_s18 }
 0x2db   : > { %v917_v1 = vpop.permute.xlu1 %916  ;;  %v903_v7 = vpop.permute.xlu0 %902 }
 0x2dc   : > { %v926_v2 = vpack.c.bf16 %v917_v1, %v917_v1  ;;  %v912_v13 = vpack.c.bf16 %v903_v7, %v903_v7 }
 0x2de   : > { %v994_v4 = vsel %vm943_vm5, %v926_v2, 0 }
 0x2df   : > { %v920_v5 = vpop.permute.xlu1 %919  ;;  %2454 = vmatpush3.bf16.xpose.msra.mxu0 %v994_v4 }
 0x2e0   : > { %v927_v6 = vpack.c.bf16 %v920_v5, %v920_v5  ;;  %2465 = vmatprep.subr.bf16.mxu0 %v2732_v11 }
 0x2e2   : > { %v1040_v10 = vsel %vm943_vm5, %v927_v6, 0 }
 0x2e3   : > { %v923_v12 = vpop.permute.xlu1 %922  ;;  %2460 = vmatpush3.bf16.xpose.msra.mxu1 %v1040_v10 }
 0x2e4   : > { %v928_v14 = vpack.c.bf16 %v923_v12, %v923_v12  ;;  %2471 = vmatprep.subr.bf16.mxu1 %v2732_v11 }
 0x2e6   : > { %v1086_v15 = vsel %vm943_vm5, %v928_v14, 0  ;;  %2456 = vmatmul.mubr.msk.bf16.vlgmr.msra.gmra.mxu0 %vm943_vm5, %v912_v13 }
 0x2e7   : > { %v906_v17 = vpop.permute.xlu1 %905  ;;  %2466 = vmatpush3.bf16.xpose.msra.mxu0 %v1086_v15  ;;  %2467 = vmatprep.mubr.msk.bf16.mxu0 %vm2733_vm2, %v2732_v11 }
 0x2e8   : > { %v913_v18 = vpack.c.bf16 %v906_v17, %v906_v17  ;;  %2477 = vmatprep.subr.bf16.mxu0 %v2732_v11 }
 0x2ea   : > { %2462 = vmatmul.mubr.msk.bf16.vlgmr.msra.gmra.mxu1 %vm943_vm5, %v913_v18 }
 0x2eb   : > { %v909_v20 = vpop.permute.xlu1 %908  ;;  %2472 = vmatpush3.bf16.msra.mxu1 %v1201_v19  ;;  %2473 = vmatprep.mubr.msk.bf16.mxu1 %vm2733_vm2, %v2732_v11 }
 0x2ec   : > { %v914_v21 = vpack.c.bf16 %v909_v20, %v909_v20  ;;  %2483 = vmatprep.subr.bf16.mxu1 %v2732_v11 }
 0x2ee   : > { %2468 = vmatmul.mubr.msk.bf16.vlgmr.msra.gmra.mxu0 %vm943_vm5, %v914_v21 }
 0x2ef   : > { %2479 = vmatprep.mubr.msk.bf16.mxu0 %vm2733_vm2, %v2732_v11 }
 0x333   : > { %v984_v22 = vpop.f32.mrf.mxu1 }
 0x334   : > { %v1128_v24 = vmul.f32 0.35355338, %v984_v22 }
 0x335   : > { %v2451_v25 = vpop.f32.mrf.mxu1 }
 0x336   : > { %v1139_v26 = vadd.f32 %v2291_v23, %v1128_v24 }
 0x337   : > { %v987_v27 = vpop.f32.mrf.mxu1 }
 0x338   : > { %v1143_v28 = vsel %vm943_vm5, %v1139_v26, -inf }
 0x339   : > { %1144 = vmax.xlane.f32.xlu1 %v1143_v28  ;;  %v2452_v29 = vpop.f32.mrf.mxu1 }
 0x3a6   : > { %v1030_v31 = vpop.f32.mrf.mxu0 }
 0x3a7   : > { %v1129_v33 = vmul.f32 0.35355338, %v1030_v31 }
 0x3a8   : > { %v2457_v34 = vpop.f32.mrf.mxu0 }
 0x3a9   : > { %v1140_v35 = vadd.f32 %v2291_v23, %v1129_v33 }
 0x3aa   : > { %v1033_v36 = vpop.f32.mrf.mxu0  ;;  %v1076_v37 = vpop.f32.mrf.mxu1 }
 0x3ab   : > { %v1130_v38 = vmul.f32 0.35355338, %v1076_v37  ;;  %v1146_v39 = vsel %vm943_vm5, %v1140_v35, -inf }
 0x3ac   : > { %v2463_v40 = vpop.f32.mrf.mxu1  ;;  %1147 = vmax.xlane.f32.xlu0 %v1146_v39  ;;  %v2458_v41 = vpop.f32.mrf.mxu0 }
 0x3ad   : > { %v1141_v42 = vadd.f32 %v2291_v23, %v1130_v38 }
 0x3ae   : > { %v1079_v43 = vpop.f32.mrf.mxu1  ;;  %v1122_v44 = vpop.f32.mrf.mxu0 }
 0x3af   : > { %v1131_v45 = vmul.f32 0.35355338, %v1122_v44  ;;  %v1149_v46 = vsel %vm943_vm5, %v1141_v42, -inf }
 0x3b0   : > { %1150 = vmax.xlane.f32.xlu1 %v1149_v46  ;;  %v2464_v47 = vpop.f32.mrf.mxu1  ;;  %v2469_v48 = vpop.f32.mrf.mxu0 }
 0x3b1   : > { %v1142_v49 = vadd.f32 %v2291_v23, %v1131_v45 }
 0x3b2   : > { %v1125_v50 = vpop.f32.mrf.mxu0 }
 0x3b3   : > { %v1152_v51 = vsel %vm943_vm5, %v1142_v49, -inf }
 0x3b4   : > { %1153 = vmax.xlane.f32.xlu1 %v1152_v51  ;;  %v2470_v52 = vpop.f32.mrf.mxu0  ;;  %v2591_v51 = vld [vmem:[%s3216_s26] sm:$0xff]  }
 0x3c2   : > { %v1145_v53 = vpop.xlane.xlu1 %1144 }
 0x3c3   : > { %v1155_v54 = vsub.f32 %v1139_v26, %v1145_v53 }
 0x3c5   : > { %v1159_v55 = vmul.f32 1.442695, %v1155_v54 }
 0x3c7   : > { %2596 = vpow2.f32 %v1159_v55 }
 0x3d4   : > { %v2597_v56 = vpop.eup %2596 }
 0x3d5   : > { %v1167_v57 = vsel %vm943_vm5, %v2597_v56, 0.0 }
 0x3d6   : > { %1168 = vadd.xlane.f32.xlu0 %v1167_v57 }
 0x435   : > { %v1148_v58 = vpop.xlane.xlu0 %1147 }
 0x436   : > { %v1156_v59 = vsub.f32 %v1140_v35, %v1148_v58 }
 0x438   : > { %v1161_v60 = vmul.f32 1.442695, %v1156_v59 }
 0x439   : > { %v1151_v61 = vpop.xlane.xlu1 %1150 }
 0x43a   : > { %2598 = vpow2.f32 %v1161_v60  ;;  %v1157_v62 = vsub.f32 %v1141_v42, %v1151_v61  ;;  %v2590_v42 = vld [vmem:[%s3216_s26 + $0x8] sm:$0xff]  }
 0x43c   : > { %v1163_v63 = vmul.f32 1.442695, %v1157_v62  ;;  %v1401_v62 = vsub.s32 5, %v2973_v30 }
 0x43d   : > { %v1154_v5 = vpop.xlane.xlu1 %1153 }
 0x43e   : > { %2600 = vpow2.f32 %v1163_v63  ;;  %v1158_v6 = vsub.f32 %v1142_v49, %v1154_v5  ;;  %v1402_v63 = vrot.slane %v2977_v32, %v1401_v62 }
 0x440   : > { %v1165_v7 = vmul.f32 1.442695, %v1158_v6 }
 0x447   : > { %v2599_v0 = vpop.eup %2598 }
 0x448   : > { %v1170_v1 = vsel %vm943_vm5, %v2599_v0, 0.0 }
 0x449   : > { %1171 = vadd.xlane.f32.xlu1 %v1170_v1 }
 0x44b   : > { %v2601_v2 = vpop.eup %2600 }
 0x44c   : > { %v1173_v3 = vsel %vm943_vm5, %v2601_v2, 0.0 }
 0x44d   : > { %1174 = vadd.xlane.f32.xlu0 %v1173_v3 }
 0x45a   : > { %933 = vrot.lane.b32.xlu1 %v3014_v8, %s2735_s6 }
 0x45f   : > { %v1169_v4 = vpop.xlane.xlu0 %1168 }
 0x460   : > { %2602 = vrcp.f32 %v1169_v4 }
 0x461   : > { %2604 = vpow2.f32 %v1165_v7 }
 0x463   : > { %930 = vrot.lane.b32.xlu0 %v3014_v8, %s2734_s5 }
 0x46d   : > { %v2603_v10 = vpop.eup %2602 }
 0x46e   : > { %v1183_v12 = vmul.f32 %v2603_v10, %v2597_v56  ;;  %v2605_v14 = vpop.eup %2604 }
 0x46f   : > { %v1176_v15 = vsel %vm943_vm5, %v2605_v14, 0.0 }
 0x470   : > { %v1187_v13 = vpack.c.bf16 %v1183_v12, %v1183_v12 }
 0x472   : > { %1192 = vst.msk [vmem:[%s2943_s4] sm:$0xf] %vm1191_vm7, %v1187_v13  ;;  %2474 = vmatmul.mubr.msk.bf16.vlgmr.msra.gmra.mxu1 %vm943_vm5, %v1187_v13 }
 0x473   : > { %2485 = vmatprep.mubr.msk.bf16.mxu1 %vm2733_vm2, %v2732_v11 }
 0x47e   : > { %1177 = vadd.xlane.f32.xlu1 %v1176_v15 }
 0x48f   : > { %936 = vrot.lane.b32.xlu1 %v3014_v8, %s2736_s18 }
 0x4d2   : > { %v1172_v16 = vpop.xlane.xlu1 %1171 }
 0x4d3   : > { %2606 = vrcp.f32 %v1172_v16 }
 0x4d6   : > { %v1175_v17 = vpop.xlane.xlu0 %1174  ;;  %v934_v18 = vpop.permute.xlu1 %933 }
 0x4d7   : > { %2608 = vrcp.f32 %v1175_v17  ;;  %v941_v19 = vpack.c.bf16 %v934_v18, %v934_v18 }
 0x4d9   : > { %v1293_v20 = vsel %vm1199_vm6, %v941_v19, 0 }
 0x4da   : > { %v931_v21 = vpop.permute.xlu0 %930  ;;  %2484 = vmatpush3.bf16.msra.mxu1 %v1293_v20 }
 0x4db   : > { %v940_v22 = vpack.c.bf16 %v931_v21, %v931_v21  ;;  %2495 = vmatprep.subr.bf16.mxu1 %v2732_v11 }
 0x4dd   : > { %v1247_v23 = vsel %vm1199_vm6, %v940_v22, 0  ;;  %v1481_v22 = vsub.s32 6, %v2973_v30 }
 0x4de   : > { %2478 = vmatpush3.bf16.msra.mxu0 %v1247_v23  ;;  %v1487_v23 = vsub.s32 7, %v2973_v30 }
 0x4df   : > { %2489 = vmatprep.subr.bf16.mxu0 %v2732_v11 }
 0x4e0   : > { %v2607_v8 = vpop.eup %2606 }
 0x4e1   : > { %v1184_v24 = vmul.f32 %v2607_v8, %v2599_v0  ;;  %v1482_v8 = vrot.slane %v2977_v32, %v1481_v22 }
 0x4e3   : > { %v1188_v25 = vpack.c.bf16 %v1184_v24, %v1184_v24  ;;  %v1488_v24 = vrot.slane %v2977_v32, %v1487_v23 }
 0x4e4   : > { %v2609_v26 = vpop.eup %2608 }
 0x4e5   : > { %1193 = vst.msk [vmem:[%s2943_s4 + $0x4] sm:$0xf] %vm1191_vm7, %v1188_v25  ;;  %2480 = vmatmul.mubr.msk.bf16.vlgmr.msra.gmra.mxu0 %vm943_vm5, %v1188_v25  ;;  %v1185_v27 = vmul.f32 %v2609_v26, %v2601_v2 }
 0x4e6   : > { %2491 = vmatprep.mubr.msk.bf16.mxu0 %vm2733_vm2, %v2732_v11 }
 0x4e7   : > { %v1189_v28 = vpack.c.bf16 %v1185_v27, %v1185_v27 }
 0x4e9   : > { %1194 = vst.msk [vmem:[%s2943_s4 + $0x8] sm:$0xf] %vm1191_vm7, %v1189_v28  ;;  %2486 = vmatmul.mubr.msk.bf16.vlgmr.msra.gmra.mxu1 %vm943_vm5, %v1189_v28 }
 0x4ea   : > { %2499 = vmatprep.mubr.msk.bf16.mxu1 %vm2733_vm2, %v2732_v11  ;;  %2496 = vmatpush3.bf16.msra.mxu1 %v2590_v42 }
 0x4eb   : > { %2497 = vmatprep.subr.bf16.mxu1 %v2732_v11 }
 0x4ee   : > { %2498 = vmatpush3.bf16.msra.mxu1 %v2591_v51 }
 0x507   : > { %v1178_v29 = vpop.xlane.xlu1 %1177 }
 0x508   : > { %2610 = vrcp.f32 %v1178_v29 }
 0x50b   : > { %v937_v31 = vpop.permute.xlu1 %936 }
 0x50c   : > { %v942_v33 = vpack.c.bf16 %v937_v31, %v937_v31 }
 0x50e   : > { %v1339_v34 = vsel %vm1199_vm6, %v942_v33, 0 }
 0x50f   : > { %2490 = vmatpush3.bf16.msra.mxu0 %v1339_v34 }
 0x515   : > { %v2611_v35 = vpop.eup %2610 }
 0x516   : > { %v1186_v36 = vmul.f32 %v2611_v35, %v2605_v14 }
 0x518   : > { %v1190_v37 = vpack.c.bf16 %v1186_v36, %v1186_v36 }
 0x51a   : > { %1195 = vst.msk [vmem:[%s2943_s4 + $0xc] sm:$0xf] %vm1191_vm7, %v1190_v37  ;;  %2492 = vmatmul.mubr.msk.bf16.vlgmr.msra.gmra.mxu0 %vm943_vm5, %v1190_v37 }
 0x532   : > { %v1237_v38 = vpop.f32.mrf.mxu1 }
 0x534   : > { %v2475_v39 = vpop.f32.mrf.mxu1 }
 0x536   : > { %v1240_v40 = vpop.f32.mrf.mxu1 }
 0x538   : > { %v2476_v41 = vpop.f32.mrf.mxu1 }
 0x5a5   : > { %v1283_v43 = vpop.f32.mrf.mxu0 }
 0x5a6   : > { %1382 = vrot.lane.b32.xlu0 %v1283_v43, %s2737_s17 }
 0x5a7   : > { %v2481_v44 = vpop.f32.mrf.mxu0 }
 0x5a9   : > { %v1286_v45 = vpop.f32.mrf.mxu0  ;;  %v1329_v46 = vpop.f32.mrf.mxu1 }
 0x5aa   : > { %1386 = vrot.lane.b32.xlu1 %v1329_v46, %s2738_s16 }
 0x5ab   : > { %v2482_v47 = vpop.f32.mrf.mxu0  ;;  %v2487_v48 = vpop.f32.mrf.mxu1 }
 0x5ad   : > { %v1332_v49 = vpop.f32.mrf.mxu1 }
 0x5af   : > { %v2488_v50 = vpop.f32.mrf.mxu1 }
 0x5da   : > { %v1375_v52 = vpop.f32.mrf.mxu0 }
 0x5db   : > { %1390 = vrot.lane.b32.xlu0 %v1375_v52, %s2739_s28 }
 0x5dc   : > { %v2493_v53 = vpop.f32.mrf.mxu0 }
 0x5de   : > { %v1378_v54 = vpop.f32.mrf.mxu0 }
 0x5e0   : > { %v2494_v11 = vpop.f32.mrf.mxu0 }
 0x618   : > { %v1383_v55 = vpop.permute.xlu0 %1382 }
 0x619   : > { %v1393_v57 = vsel %vm943_vm5, %v1237_v38, %v1383_v55 }
 0x61c   : > { %v1387_v56 = vpop.permute.xlu1 %1386 }
 0x61d   : > { %v1395_v58 = vsel %vm1394_vm8, %v1393_v57, %v1387_v56 }
 0x64d   : > { %v1391_v59 = vpop.permute.xlu0 %1390 }
 0x64e   : > { %v1397_v60 = vsel %vm1396_vm9, %v1395_v58, %v1391_v59 }
 0x64f   : > { %v1398_v61 = vpack.c.bf16 %v1397_v60, %v1397_v60 }
 0x651   : > { %2500 = vmatmul.mubr.msk.bf16.vlgmr.msra.gmra.mxu1 %vm697_vm1, %v1398_v61 }
 0x711   : > { %v1452_v0 = vpop.f32.mrf.mxu1 }
 0x712   : > { %v1453_v1 = vadd.f32 %v1452_v0, %v1402_v63 }
 0x713   : > { %v2501_v2 = vpop.f32.mrf.mxu1 }
 0x714   : > { %v1458_v3 = vadd.f32 %v1453_v1, %v2951_v9 }
 0x715   : > { %v1455_v4 = vpop.f32.mrf.mxu1 }
 0x716   : > { %1459 = vst.msk [vmem:[%s2924_s2] sm:$0xff] %vm697_vm1, %v1458_v3  ;;  %v1460_v5 = vsel %vm697_vm1, %v1458_v3, 0.0 }
 0x717   : > { %1461 = vadd.xlane.f32.xlu1 %v1460_v5  ;;  %v2502_v6 = vpop.f32.mrf.mxu1 }
 0x7a0   : > { %v1462_v7 = vpop.xlane.xlu1 %1461 }
 0x7a1   : > { %v1463_v10 = vmul.f32 0.03125, %v1462_v7 }
 0x7a3   : > { %v1464_v12 = vsub.f32 %v1458_v3, %v1463_v10 }
 0x7a5   : > { %v1465_v13 = vmul.f32 %v1464_v12, %v1464_v12  ;;  %v1483_v25 = vmul.f32 %v1482_v8, %v1464_v12 }
 0x7a7   : > { %v1466_v14 = vsel %vm697_vm1, %v1465_v13, 0.0 }
 0x7a8   : > { %1467 = vadd.xlane.f32.xlu0 %v1466_v14 }
 0x831   : > { %v1468_v15 = vpop.xlane.xlu0 %1467 }
 0x832   : > { %v1469_v16 = vmul.f32 0.032258064, %v1468_v15 }
 0x834   : > { %2612 = vrsqrt.f32 %v1469_v16  ;;  %vm1472_vm10 = vcmp.eq.f32.partialorder %v1469_v16, inf  ;;  %v1475_v9 = vand.u32 2147483648, %v1469_v16  ;;  %vm1474_vm11 = vcmp.eq.f32.partialorder %v1469_v16, 0.0 }
 0x841   : > { %v2613_v17 = vpop.eup %2612 }
 0x842   : > { %v1471_v18 = vmul.f32 %v2613_v17, %v1469_v16 }
 0x844   : > { %v1473_v19 = vsel %vm1472_vm10, %v1469_v16, %v1471_v18 }
 0x845   : > { %v1476_v20 = vsel %vm1474_vm11, %v1475_v9, %v1473_v19 }
 0x846   : > { %v1477_v21 = vadd.f32 1e-06, %v1476_v20 }
 0x848   : > { %2614 = vrcp.f32 %v1477_v21 }
 0x855   : > { %v2615_v26 = vpop.eup %2614 }
 0x856   : > { %v1484_v27 = vmul.f32 %v2615_v26, %v1483_v25 }
 0x858   : > { %v1489_v28 = vadd.f32 %v1488_v24, %v1484_v27 }
 0x85a   : > { %v1490_v29 = vpack.c.bf16 %v1489_v28, %v1489_v28 }
 0x85c   : > { %1492 = vst.msk [vmem:[#allocation2] sm:$0xf] %vm1491_vm12, %v1490_v29 }
 0x85d PF: > { %v2616_v30 = vld [vmem:[%s2946_s21 + $0x24] ss:$16 sps:$4 sm:$0xff]   ;;  %v2618_v31 = vld [vmem:[%s2946_s21 + $0x2c] ss:$16 sps:$4 sm:$0xff]   ;;  %v2740_v33 = vmov 0   ;;  %vm1629_vm13 = vcmask 261120   ;;  %v1569_v7 = vlaneseq }
 0x85e   : > { %1665 = vmatprep.mubr.bf16.mxu0 %v2740_v33  ;;  %1706 = vmatprep.mubr.bf16.mxu1 %v2740_v33  ;;  %v2620_v32 = vld [vmem:[%s2946_s21 + $0x20] ss:$16 sps:$4 sm:$0xff]   ;;  %v2621_v34 = vld [vmem:[%s2946_s21 + $0x28] ss:$16 sps:$4 sm:$0xff]   ;;  %v2622_v35 = vld [vmem:[%s2946_s21 + $0x4] ss:$16 sps:$4 sm:$0xff]  }
 0x85f   : > { %1645 = vmatprep.subr.bf16.mxu0 %v2616_v30  ;;  %1686 = vmatprep.subr.bf16.mxu1 %v2618_v31  ;;  %v2624_v36 = vld [vmem:[%s2946_s21 + $0xc] ss:$16 sps:$4 sm:$0xff]   ;;  %v2626_v37 = vld [vmem:[%s2946_s21] ss:$16 sps:$4 sm:$0xff]   ;;  %v2627_v38 = vld [vmem:[%s2946_s21 + $0x8] ss:$16 sps:$4 sm:$0xff]  }
 0x860   : > { %1646 = vmatpush1.bf16.msra.mxu0 %v2620_v32  ;;  %1687 = vmatpush1.bf16.msra.mxu1 %v2621_v34  ;;  %v2628_v40 = vld [vmem:[%s2938_s13 + $0x78] sm:$0xff]   ;;  %v2632_v44 = vld [vmem:[%s2938_s13 + $0x70] sm:$0xff]   ;;  %v2636_v48 = vld [vmem:[%s2938_s13 + $0x68] sm:$0xff]   ;;  %v1570_v10 = vshrl.u32 %v1569_v7, 7  ;;  %p2341_p6 = scmp.ne.s32.totalorder %s2706_s19, 3 }
 0x861   : > { %1647 = vmatprep.subr.bf16.mxu0 %v2622_v35  ;;  %1688 = vmatprep.subr.bf16.mxu1 %v2624_v36  ;;  %v2629_v41 = vld [vmem:[%s2938_s13 + $0xf8] sm:$0xff]   ;;  %v2633_v45 = vld [vmem:[%s2938_s13 + $0xf0] sm:$0xff]   ;;  %v2637_v49 = vld [vmem:[%s2938_s13 + $0xe8] sm:$0xff]  }
 0x862   : > { %v2630_v42 = vld [vmem:[%s2938_s13 + $0x38] sm:$0xff]   ;;  %v2634_v46 = vld [vmem:[%s2938_s13 + $0x30] sm:$0xff]   ;;  %v2638_v50 = vld [vmem:[%s2938_s13 + $0x28] sm:$0xff]   ;;  %v1571_v12 = vsub.s32 0, %v1570_v10  ;;  %v1579_v13 = vsub.s32 2, %v1570_v10  ;;  %v1575_v15 = vsub.s32 1, %v1570_v10 }
 0x863   : > { %v1567_v39 = vld [vmem:[#allocation2] sm:$0xf]  ;;  %v2631_v43 = vld [vmem:[%s2938_s13 + $0xb8] sm:$0xff]   ;;  %v2635_v47 = vld [vmem:[%s2938_s13 + $0xb0] sm:$0xff]   ;;  %v1583_v16 = vsub.s32 3, %v1570_v10 }
 0x864   : > { %1648 = vmatpush1.bf16.msra.mxu0 %v2626_v37  ;;  %1689 = vmatpush1.bf16.msra.mxu1 %v2627_v38  ;;  %v2639_v51 = vld [vmem:[%s2938_s13 + $0xa8] sm:$0xff]   ;;  %v2640_v52 = vld [vmem:[%s2938_s13 + $0x60] sm:$0xff]   ;;  %v2644_v55 = vld [vmem:[%s2938_s13 + $0x58] sm:$0xff]  }
 0x865   : > { %2379 = vmatprep.subr.bf16.mxu0 %v2628_v40  ;;  %2401 = vmatprep.subr.bf16.mxu1 %v2629_v41  ;;  %v2641_v53 = vld [vmem:[%s2938_s13 + $0xe0] sm:$0xff]   ;;  %v2645_v56 = vld [vmem:[%s2938_s13 + $0xd8] sm:$0xff]   ;;  %v2648_v59 = vld [vmem:[%s2938_s13 + $0x50] sm:$0xff]  }
 0x866   : > { %v2642_v54 = vld [vmem:[%s2938_s13 + $0x20] sm:$0xff]   ;;  %v2646_v57 = vld [vmem:[%s2938_s13 + $0x18] sm:$0xff]   ;;  %v2649_v60 = vld [vmem:[%s2938_s13 + $0xd0] sm:$0xff]  }
 0x867   : > { %2307 = vmatmul.mubr.msk.bf16.vlgmr.msra.gmra.mxu0 %vm1629_vm13, %v1567_v39  ;;  %2308 = vmatmul.mubr.msk.bf16.vlgmr.msra.gmra.mxu1 %vm1629_vm13, %v1567_v39  ;;  %v2643_v11 = vld [vmem:[%s2938_s13 + $0xa0] sm:$0xff]   ;;  %v2647_v58 = vld [vmem:[%s2938_s13 + $0x98] sm:$0xff]   ;;  %v2650_v61 = vld [vmem:[%s2938_s13 + $0x10] sm:$0xff]  }
 0x868   : > { %2380 = vmatpush3.bf16.msra.mxu0 %v2630_v42  ;;  %2402 = vmatpush3.bf16.msra.mxu1 %v2631_v43  ;;  %v2651_v62 = vld [vmem:[%s2938_s13 + $0x90] sm:$0xff]   ;;  %v2652_v63 = vld [vmem:[%s2938_s13 + $0x48] sm:$0xff]   ;;  %v2656_v3 = vld [vmem:[%s2938_s13 + $0x40] sm:$0xff]  }
 0x869   : > { %2381 = vmatprep.subr.bf16.mxu0 %v2632_v44  ;;  %2403 = vmatprep.subr.bf16.mxu1 %v2633_v45  ;;  %v2653_v0 = vld [vmem:[%s2938_s13 + $0xc8] sm:$0xff]   ;;  %v2657_v4 = vld [vmem:[%s2938_s13 + $0xc0] sm:$0xff]  }
 0x86a   : > { %v2654_v1 = vld [vmem:[%s2938_s13 + $0x8] sm:$0xff]   ;;  %v2658_v5 = vld [vmem:[%s2938_s13] sm:$0xff]  }
 0x86b   : > { %v2655_v2 = vld [vmem:[%s2938_s13 + $0x88] sm:$0xff]   ;;  %v2659_v6 = vld [vmem:[%s2938_s13 + $0x80] sm:$0xff]  }
 0x86c   : > { %2382 = vmatpush3.bf16.msra.mxu0 %v2634_v46  ;;  %2404 = vmatpush3.bf16.msra.mxu1 %v2635_v47  ;;  %v1502_v14 = vld [vmem:[%s2930_s0] sm:$0xf]  ;;  %v1719_v45 = vld [vmem:[#allocation3] sm:$0xff] }
 0x86d   : > { %2383 = vmatprep.subr.bf16.mxu0 %v2636_v48  ;;  %2405 = vmatprep.subr.bf16.mxu1 %v2637_v49  ;;  %v1572_v17 = vrot.slane %v1502_v14, %v1571_v12  ;;  %v1580_v18 = vrot.slane %v1502_v14, %v1579_v13  ;;  %v1576_v9 = vrot.slane %v1502_v14, %v1575_v15 }
 0x86e   : > { %v1584_v19 = vrot.slane %v1502_v14, %v1583_v16 }
 0x870   : > { %2384 = vmatpush3.bf16.msra.mxu0 %v2638_v50  ;;  %2406 = vmatpush3.bf16.msra.mxu1 %v2639_v51 }
 0x871   : > { %2385 = vmatprep.subr.bf16.mxu0 %v2640_v52  ;;  %2407 = vmatprep.subr.bf16.mxu1 %v2641_v53 }
 0x874   : > { %2386 = vmatpush3.bf16.msra.mxu0 %v2642_v54  ;;  %2408 = vmatpush3.bf16.msra.mxu1 %v2643_v11 }
 0x875   : > { %2387 = vmatprep.subr.bf16.mxu0 %v2644_v55  ;;  %2409 = vmatprep.subr.bf16.mxu1 %v2645_v56 }
 0x878   : > { %2388 = vmatpush3.bf16.msra.mxu0 %v2646_v57  ;;  %2410 = vmatpush3.bf16.msra.mxu1 %v2647_v58 }
 0x879   : > { %2389 = vmatprep.subr.bf16.mxu0 %v2648_v59  ;;  %2411 = vmatprep.subr.bf16.mxu1 %v2649_v60 }
 0x87c   : > { %2390 = vmatpush3.bf16.msra.mxu0 %v2650_v61  ;;  %2412 = vmatpush3.bf16.msra.mxu1 %v2651_v62 }
 0x87d   : > { %2391 = vmatprep.subr.bf16.mxu0 %v2652_v63  ;;  %2413 = vmatprep.subr.bf16.mxu1 %v2653_v0 }
 0x880   : > { %2392 = vmatpush3.bf16.msra.mxu0 %v2654_v1  ;;  %2414 = vmatpush3.bf16.msra.mxu1 %v2655_v2 }
 0x881   : > { %2393 = vmatprep.subr.bf16.mxu0 %v2656_v3  ;;  %2415 = vmatprep.subr.bf16.mxu1 %v2657_v4 }
 0x884   : > { %2394 = vmatpush3.bf16.msra.mxu0 %v2658_v5  ;;  %2416 = vmatpush3.bf16.msra.mxu1 %v2659_v6 }
 0x927   : > { %v1667_v20 = vpop.f32.mrf.mxu0  ;;  %v1708_v21 = vpop.f32.mrf.mxu1 }
 0x928   : > { %v1668_v22 = vadd.f32 %v1667_v20, %v1572_v17  ;;  %v1709_v23 = vadd.f32 %v1708_v21, %v1580_v18 }
 0x929   : > { %v1669_v8 = vpop.f32.mrf.mxu0  ;;  %v1710_v24 = vpop.f32.mrf.mxu1 }
 0x92a   : > { %v1670_v25 = vadd.f32 %v1669_v8, %v1576_v9  ;;  %v1711_v26 = vadd.f32 %v1710_v24, %v1584_v19  ;;  %v1715_v27 = vmax.f32 %v1668_v22, 0.0  ;;  %v1717_v28 = vmax.f32 %v1709_v23, 0.0 }
 0x92b   : > { %v1671_v29 = vpop.f32.mrf.mxu0  ;;  %v1712_v30 = vpop.f32.mrf.mxu1 }
 0x92c   : > { %v1716_v31 = vmax.f32 %v1670_v25, 0.0  ;;  %v1718_v33 = vmax.f32 %v1711_v26, 0.0  ;;  %v1720_v37 = vpack.c.bf16 %v1715_v27, %v1715_v27  ;;  %v1722_v38 = vpack.c.bf16 %v1717_v28, %v1717_v28 }
 0x92d   : > { %v1672_v32 = vpop.f32.mrf.mxu0  ;;  %v1713_v34 = vpop.f32.mrf.mxu1 }
 0x92e   : > { %v1721_v35 = vpack.c.bf16 %v1716_v31, %v1716_v31  ;;  %v1723_v36 = vpack.c.bf16 %v1718_v33, %v1718_v33 }
 0x930   : > { %1948 = vmatprep.mubr.bf16.mxu0 %v1721_v35  ;;  %1988 = vmatprep.mubr.bf16.mxu1 %v1723_v36 }
 0x931   : > { %1949 = vmatmul.mubr.bf16.vlgmr.msra.gmra.mxu0 %v1720_v37  ;;  %1989 = vmatmul.mubr.bf16.vlgmr.msra.gmra.mxu1 %v1722_v38 }
 0x9f1   : > { %v2395_v39 = vpop.f32.mrf.mxu0  ;;  %v2417_v40 = vpop.f32.mrf.mxu1 }
 0x9f3   : > { %v2396_v41 = vpop.f32.mrf.mxu0  ;;  %v2418_v42 = vpop.f32.mrf.mxu1 }
 0x9f4   : > { %v2397_v43 = vadd.f32 %v2396_v41, %v2395_v39  ;;  %v2419_v44 = vadd.f32 %v2418_v42, %v2417_v40 }
 0x9f5   : > { %v2398_v46 = vpop.f32.mrf.mxu0  ;;  %v2420_v47 = vpop.f32.mrf.mxu1 }
 0x9f6   : > { %v1991_v48 = vadd.f32 %v2419_v44, %v2397_v43  ;;  %2001 = sbr.rel (%p2341_p6) target bundleno = 2567 (0xa07), region = 95 }
 0x9f7   : > { %v2399_v49 = vpop.f32.mrf.mxu0  ;;  %v2421_v50 = vpop.f32.mrf.mxu1 }
 0x9f8   : > { %v1996_v51 = vadd.f32 %v1991_v48, %v1719_v45 }
 0x9fa   : > { %1997 = vst.msk [vmem:[#allocation3] sm:$0xff] %vm1629_vm13, %v1996_v51 }
 0x9fb   : > { %v2342_v52 = vld [vmem:[%s2898_s23 + $0x8] ss:$0 sm:$0xff]  ;;  %v2003_v53 = vld [vmem:[%s2924_s2] sm:$0xff] }
 0xa01   : > { %v2004_v54 = vld [vmem:[#allocation3] sm:$0xff] }
 0xa02   : > { %v2005_v11 = vadd.f32 %v2004_v54, %v2003_v53 }
 0xa04   : > { %v2010_v55 = vadd.f32 %v2342_v52, %v2005_v11 }
 0xa06   : > { %2011 = vst.msk [vmem:[%s2924_s2] sm:$0xff] %vm1629_vm13, %v2010_v55 }
 0xa07 PF: > { %s3217_s22 = sld [smem:[#allocation9_spill]] }
 0xa08   : > { %s3218_s17 = sld [smem:[#allocation5_spill]] }
 0xa09   : > { %s3219_s18 = sld [smem:[#allocation13_spill]] }
 0xa0a   : > { %s3220_s19 = sld [smem:[#allocation6_spill]] }
 0xa0b   : > { %s3221_s20 = sld [smem:[#allocation7_spill]] }
 0xa0c   : > { %s3222_s21 = sld [smem:[#allocation8_spill]] }
 0xa0d   : > { %s22_s25 = sadd.s32 1, %s3217_s22   ;;  %s3223_s22 = sld [smem:[#allocation10_spill]] }
 0xa0e   : > { %p19_p7 = scmp.ge.s32.totalorder %s22_s25, 18   ;;  %s3224_s23 = sld [smem:[#allocation11_spill]] }
 0xa0f   : > { %s3225_s24 = sld [smem:[#allocation12_spill]] }
 0xa10   :  { %21 = sbr.rel (!%p19_p7) target bundleno = 15 (0xf), region = 169 }

</bundles_post_ra>
